<compile_context>
chip_gen: v6e
topology: v6e:2x2x1
jax: 0.10.0
libtpu: 0.0.40
codegen_flags: <defaults>
</compile_context>

<pallas_src>
import functools

import jax
import jax.numpy as jnp
from jax.experimental import pallas as pl
from jax.experimental.pallas import tpu as pltpu

BN_EPS = 1e-5
_MIB = 1024 * 1024


def _vmem_limit(step_bytes):
    # Generation-safe scoped-VMEM hint: at least the 32 MiB default, never more
    # than fits comfortably under v7x's 64 MiB physical VMEM.
    return int(min(48 * _MIB, max(32 * _MIB, 4 * step_bytes)))


# ----------------------------- Pallas kernels ------------------------------ #

def _conv1x1_kernel(x_ref, w_ref, b_ref, o_ref, *, relu):
    # x_ref: (1, Cin, P) bf16; w_ref: (Cout, Cin) bf16 (BN scale pre-folded);
    # b_ref: (Cout, 1) f32 shift.  Lane-dense output block (1, Cout, P).
    y = jnp.dot(w_ref[...], x_ref[0], preferred_element_type=jnp.float32)
    y = y + b_ref[...]
    if relu:
        y = jnp.maximum(y, 0.0)
    o_ref[0] = y.astype(o_ref.dtype)


def _make_add_conv_kernel(n_terms):
    # Fused (x0 + x1 [+ x2]) -> 1x1 conv (no bias).  Sum in f32, MXU in bf16,
    # f32 accumulation.  2-input variant avoids streaming a zeros tensor when
    # enable_lfu=False.
    def kernel(*refs):
        x_refs, w_ref, o_ref = refs[:n_terms], refs[n_terms], refs[n_terms + 1]
        acc = x_refs[0][0].astype(jnp.float32)
        for r in x_refs[1:]:
            acc = acc + r[0].astype(jnp.float32)
        o_ref[0] = jnp.dot(w_ref[...], acc.astype(jnp.bfloat16),
                           preferred_element_type=jnp.float32).astype(o_ref.dtype)
    return kernel


def _fourier_unit_kernel(x_ref, kr_ref, ki_ref, wrr_ref, wri_ref, wir_ref,
                         wii_ref, sr_ref, si_ref, lr_ref, li_ref, o_ref):
    # Whole FourierUnit for one batch element in one kernel:
    #   rfft2 (as matmul) -> 1x1 conv over (re, im) channel pairs + folded BN +
    #   ReLU -> irfft2 (as matmul, optionally periodically tiled to (H, W)).
    x = x_ref[0].astype(jnp.float32)                                  # (Cin, Pin)
    # forward real 2-D DFT: f32 matmuls for FFT fidelity.
    fr = jnp.dot(x, kr_ref[...], preferred_element_type=jnp.float32)  # (Cin, Q)
    fi = jnp.dot(x, ki_ref[...], preferred_element_type=jnp.float32)
    frb = fr.astype(jnp.bfloat16)
    fib = fi.astype(jnp.bfloat16)
    # 1x1 conv over channels (weights pre-split into re/im blocks, BN folded).
    yr = (jnp.dot(wrr_ref[...], frb, preferred_element_type=jnp.float32)
          + jnp.dot(wri_ref[...], fib, preferred_element_type=jnp.float32)
          + sr_ref[...])
    yi = (jnp.dot(wir_ref[...], frb, preferred_element_type=jnp.float32)
          + jnp.dot(wii_ref[...], fib, preferred_element_type=jnp.float32)
          + si_ref[...])
    yr = jnp.maximum(yr, 0.0)
    yi = jnp.maximum(yi, 0.0)
    # inverse real 2-D DFT (Hermitian doubling + optional 2x2 repeat folded in).
    out = (jnp.dot(yr, lr_ref[...], preferred_element_type=jnp.float32)
           + jnp.dot(yi, li_ref[...], preferred_element_type=jnp.float32))
    o_ref[0] = out.astype(o_ref.dtype)


# --------------------------- host-side helpers ------------------------------ #

def _fold_bn(bn):
    scale = bn["gamma"] / jnp.sqrt(bn["var"] + BN_EPS)
    shift = bn["beta"] - bn["mean"] * scale
    return scale, shift


def _rdft2_matrices(h, w, out_h, out_w):
    """Real 2-D DFT (ortho norm) as matmul matrices.

    forward:  Fr = X @ kr, Fi = X @ ki          X: (..., h*w) row-major (h, w)
    inverse:  out = Yr @ lr + Yi @ li           out: (..., out_h*out_w)
    If (out_h, out_w) != (h, w), the inverse output is the periodic tiling of
    the h x w irfft2 result (this folds the LFU's 2x2 repeat into the matrix).
    """
    wf = w // 2 + 1
    hh = jnp.arange(h)
    ww = jnp.arange(w)
    vv = jnp.arange(wf)
    ph = ((hh[:, None] * hh[None, :]) % h).astype(jnp.float32) / h      # (h, h)
    pw = ((ww[:, None] * vv[None, :]) % w).astype(jnp.float32) / w      # (w, wf)
    ang = 2.0 * jnp.pi * (ph[:, None, :, None] + pw[None, :, None, :])  # (h,w,h,wf)
    scale = 1.0 / jnp.sqrt(jnp.float32(h * w))
    kr = (jnp.cos(ang) * scale).reshape(h * w, h * wf)
    ki = (-jnp.sin(ang) * scale).reshape(h * w, h * wf)
    # inverse = alpha-weighted transpose; alpha doubles the non-DC/Nyquist
    # columns to account for the Hermitian half-spectrum.
    alpha = jnp.full((wf,), 2.0, jnp.float32).at[0].set(1.0)
    if w % 2 == 0:
        alpha = alpha.at[w // 2].set(1.0)
    alpha_cols = jnp.tile(alpha, h)                                      # (h*wf,)
    lr = (kr * alpha_cols[None, :]).T                                    # (h*wf, h*w)
    li = (ki * alpha_cols[None, :]).T
    if (out_h, out_w) != (h, w):
        rh, rw = out_h // h, out_w // w
        lr = jnp.tile(lr.reshape(h * wf, h, w), (1, rh, rw)).reshape(h * wf, out_h * out_w)
        li = jnp.tile(li.reshape(h * wf, h, w), (1, rh, rw)).reshape(h * wf, out_h * out_w)
    return kr, ki, lr, li


def _fu_conv_weights(p):
    # Fold BN scale into the conv weight, then split the interleaved
    # (c*2 + {re, im}) rows/cols into four real blocks so the activation never
    # needs the interleaving copy.
    scale, shift = _fold_bn(p["bn"])
    w = p["w"] * scale[:, None]                     # (2*Cout, 2*Cin)
    wrr = w[0::2, 0::2].astype(jnp.bfloat16)
    wri = w[0::2, 1::2].astype(jnp.bfloat16)
    wir = w[1::2, 0::2].astype(jnp.bfloat16)
    wii = w[1::2, 1::2].astype(jnp.bfloat16)
    sr = shift[0::2][:, None].astype(jnp.float32)
    si = shift[1::2][:, None].astype(jnp.float32)
    return wrr, wri, wir, wii, sr, si


def _rep_spec(shape):
    # Full-array block re-used at every grid step (constant index_map).
    return pl.BlockSpec(shape, lambda i: (0,) * len(shape))


# ----------------------------- kernel wrappers ------------------------------ #

def conv1x1(x, w_folded, shift, *, relu, out_dtype):
    """1x1 conv (+ folded BN + optional ReLU).  x: (N, Cin, P)."""
    n, c_in, p = x.shape
    c_out = w_folded.shape[0]
    w_bf = w_folded.astype(jnp.bfloat16)
    b = shift.reshape(c_out, 1).astype(jnp.float32)
    step_bytes = 2 * (c_in * p * 2 + c_out * p * jnp.dtype(out_dtype).itemsize)
    return pl.pallas_call(
        functools.partial(_conv1x1_kernel, relu=relu),
        out_shape=jax.ShapeDtypeStruct((n, c_out, p), out_dtype),
        grid=(n,),
        in_specs=[
            pl.BlockSpec((1, c_in, p), lambda i: (i, 0, 0)),
            _rep_spec((c_out, c_in)),
            _rep_spec((c_out, 1)),
        ],
        out_specs=pl.BlockSpec((1, c_out, p), lambda i: (i, 0, 0)),
        compiler_params=pltpu.CompilerParams(
            dimension_semantics=("parallel",),
            vmem_limit_bytes=_vmem_limit(step_bytes)),
    )(x, w_bf, b)


def add_conv1x1(streams, weight, out_dtype=jnp.float32):
    """Fused elementwise sum of `streams` followed by a 1x1 conv (no bias)."""
    n, c_in, p = streams[0].shape
    c_out = weight.shape[0]
    w_bf = weight.astype(jnp.bfloat16)
    step_bytes = 2 * (len(streams) * c_in * p * 2
                      + c_out * p * jnp.dtype(out_dtype).itemsize)
    return pl.pallas_call(
        _make_add_conv_kernel(len(streams)),
        out_shape=jax.ShapeDtypeStruct((n, c_out, p), out_dtype),
        grid=(n,),
        in_specs=[pl.BlockSpec((1, c_in, p), lambda i: (i, 0, 0)) for _ in streams]
                 + [_rep_spec((c_out, c_in))],
        out_specs=pl.BlockSpec((1, c_out, p), lambda i: (i, 0, 0)),
        compiler_params=pltpu.CompilerParams(
            dimension_semantics=("parallel",),
            vmem_limit_bytes=_vmem_limit(step_bytes)),
    )(*streams, w_bf)


def fourier_unit(x, fu_params, h, w, out_hw):
    """Fused FourierUnit.  x: (N, Cin, h*w) bf16.  Returns (N, Cout, out_h*out_w)
    bf16.  out_hw > (h, w) produces the periodic (tiled) inverse, used by LFU."""
    n, c_in, p_in = x.shape
    out_h, out_w = out_hw
    kr, ki, lr, li = _rdft2_matrices(h, w, out_h, out_w)
    wrr, wri, wir, wii, sr, si = _fu_conv_weights(fu_params)
    c_out = wrr.shape[0]
    q = kr.shape[1]
    p_out = lr.shape[1]
    step_bytes = (2 * (c_in * p_in + c_out * p_out) * 2
                  + 2 * (p_in * q + q * p_out) * 4)
    return pl.pallas_call(
        _fourier_unit_kernel,
        out_shape=jax.ShapeDtypeStruct((n, c_out, p_out), jnp.bfloat16),
        grid=(n,),
        in_specs=[
            pl.BlockSpec((1, c_in, p_in), lambda i: (i, 0, 0)),
            _rep_spec((p_in, q)), _rep_spec((p_in, q)),
            _rep_spec((c_out, c_in)), _rep_spec((c_out, c_in)),
            _rep_spec((c_out, c_in)), _rep_spec((c_out, c_in)),
            _rep_spec((c_out, 1)), _rep_spec((c_out, 1)),
            _rep_spec((q, p_out)), _rep_spec((q, p_out)),
        ],
        out_specs=pl.BlockSpec((1, c_out, p_out), lambda i: (i, 0, 0)),
        compiler_params=pltpu.CompilerParams(
            dimension_semantics=("parallel",),
            vmem_limit_bytes=_vmem_limit(step_bytes)),
    )(x, kr, ki, wrr, wri, wir, wii, sr, si, lr, li)


# ------------------------------ forward pass -------------------------------- #

def spectral_transform(x_nchw, params, *, stride=1, enable_lfu=True):
    n, c_in, h, w = x_nchw.shape
    x = x_nchw.astype(jnp.float32)
    if stride == 2:
        # TODO(synk): AvgPool2d(2,2) kept as cheap XLA glue (demo uses stride=1).
        x = x.reshape(n, c_in, h // 2, 2, w // 2, 2).mean(axis=(3, 5))
        h, w = h // 2, w // 2

    # NCHW already gives lane-dense per-batch (C, H*W) blocks -> no transposes.
    x = x.reshape(n, c_in, h * w).astype(jnp.bfloat16)

    # conv1: 1x1 conv -> BN -> ReLU (BN scale folded into the weight).
    s1, b1 = _fold_bn(params["bn1"])
    w1 = params["conv1_w"] * s1[:, None]
    xh = conv1x1(x, w1, b1, relu=True, out_dtype=jnp.bfloat16)     # (N, half, H*W)
    half = xh.shape[1]

    # global Fourier unit: one fused kernel per batch element.
    fu_out = fourier_unit(xh, params["fu"], h, w, out_hw=(h, w))

    if enable_lfu:
        c4, h2, w2 = half // 4, h // 2, w // 2
        # quadrant split (TL, BL, TR, BR) of the first half//4 channels.
        # TODO(synk): small XLA gather; could be folded into the LFU kernel.
        xs = xh.reshape(n, half, h, w)[:, :c4]
        xs = xs.reshape(n, c4, 2, h2, 2, w2)
        xs = jnp.transpose(xs, (0, 4, 2, 1, 3, 5)).reshape(n, 4 * c4, h2 * w2)
        # LFU kernel whose inverse-DFT matrix directly emits the 2x2-periodic
        # full-resolution output (no materialized jnp.tile of activations).
        lfu_out = fourier_unit(xs, params["lfu"], h2, w2, out_hw=(h, w))
        streams = [xh, fu_out, lfu_out]
    else:
        streams = [xh, fu_out]

    # conv2 fused with the elementwise sum of the streams.
    out = add_conv1x1(streams, params["conv2_w"], out_dtype=jnp.float32)
    return out.reshape(n, -1, h, w)


# ----------------------------- plain-JAX reference --------------------------- #

def _reference(x, params, *, stride=1, enable_lfu=True):
    x = x.astype(jnp.float32)
    n, c, h, w = x.shape
    if stride == 2:
        x = x.reshape(n, c, h // 2, 2, w // 2, 2).mean(axis=(3, 5))
    s1, b1 = _fold_bn(params["bn1"])
    w1 = params["conv1_w"] * s1[:, None]
    x = jnp.maximum(jnp.einsum("oc,nchw->nohw", w1, x)
                    + b1[None, :, None, None], 0.0)

    def fu_ref(xx, p):
        nn, cc, hh, ww = xx.shape
        f = jnp.fft.rfft2(xx, norm="ortho")
        ri = jnp.stack([f.real, f.imag], axis=2).reshape(nn, 2 * cc, hh, -1)
        scale, shift = _fold_bn(p["bn"])
        weff = p["w"] * scale[:, None]
        y = jnp.einsum("oc,nchw->nohw", weff, ri) + shift[None, :, None, None]
        y = jnp.maximum(y, 0.0)
        y = y.reshape(nn, -1, 2, hh, y.shape[-1])
        comp = jax.lax.complex(y[:, :, 0], y[:, :, 1])
        return jnp.fft.irfft2(comp, s=(hh, ww), norm="ortho")

    out_fu = fu_ref(x, params["fu"])
    if enable_lfu:
        nn, cc, hh, ww = x.shape
        c4, h2, w2 = cc // 4, hh // 2, ww // 2
        xs = x[:, :c4]
        xs = jnp.concatenate([xs[:, :, :h2], xs[:, :, h2:]], axis=1)
        xs = jnp.concatenate([xs[:, :, :, :w2], xs[:, :, :, w2:]], axis=1)
        xs = fu_ref(xs, params["lfu"])
        xs = jnp.tile(xs, (1, 1, 2, 2))
    else:
        xs = 0.0
    return jnp.einsum("oc,nchw->nohw", params["conv2_w"], x + out_fu + xs)


# ----------------------------- parameter init -------------------------------- #

def _init_bn(key, c):
    k1, k2, k3, k4 = jax.random.split(key, 4)
    return {
        "gamma": jax.random.uniform(k1, (c,), jnp.float32, 0.5, 1.5),
        "beta": 0.1 * jax.random.normal(k2, (c,), jnp.float32),
        "mean": 0.1 * jax.random.normal(k3, (c,), jnp.float32),
        "var": jax.random.uniform(k4, (c,), jnp.float32, 0.5, 1.5),
    }


def init_params(key, in_channels, out_channels):
    half = out_channels // 2
    keys = jax.random.split(key, 8)
    return {
        "conv1_w": 0.2 * jax.random.normal(keys[0], (half, in_channels), jnp.float32),
        "bn1": _init_bn(keys[1], half),
        "fu": {
            "w": 0.2 * jax.random.normal(keys[2], (2 * half, 2 * half), jnp.float32),
            "bn": _init_bn(keys[3], 2 * half),
        },
        "lfu": {
            "w": 0.2 * jax.random.normal(keys[4], (2 * half, 2 * half), jnp.float32),
            "bn": _init_bn(keys[5], 2 * half),
        },
        "conv2_w": 0.2 * jax.random.normal(keys[6], (out_channels, half), jnp.float32),
    }


# ----------------------------------- main ------------------------------------ #

if __name__ == "__main__":
    key = jax.random.PRNGKey(0)
    kx, kp = jax.random.split(key)

    N, C_IN, H, W = 2, 4, 16, 16
    C_OUT = 8

    x = jax.random.normal(kx, (N, C_IN, H, W), jnp.float32)
    params = init_params(kp, C_IN, C_OUT)

    fwd = jax.jit(functools.partial(spectral_transform, stride=1, enable_lfu=True))
    out = jax.block_until_ready(fwd(x, params))

    assert out.shape == (N, C_OUT, H, W), out.shape
    assert bool(jnp.isfinite(out).all())

    # numerical check vs a pure-jnp reference (bf16 matmul operands -> loose tol)
    ref = _reference(x, params, stride=1, enable_lfu=True)
    rel_err = float(jnp.max(jnp.abs(out - ref)) / (jnp.max(jnp.abs(ref)) + 1e-6))
    assert rel_err < 0.1, f"relative error too large: {rel_err}"

    print("KERNEL_OK")
</pallas_src>

<mosaic_0001>
module attributes {stable_mosaic.version = 11 : i64} {
  func.func @_conv1x1_kernel(%arg0: i32, %arg1: memref<1x4x256xbf16, #tpu.memory_space<vmem>>, %arg2: memref<4x4xbf16, #tpu.memory_space<vmem>>, %arg3: memref<4x1xf32, #tpu.memory_space<vmem>>, %arg4: memref<1x4x256xbf16, #tpu.memory_space<vmem>>) attributes {dimension_semantics = [#tpu.dimension_semantics<parallel>], iteration_bounds = array<i64: 2>, scalar_prefetch = 0 : i64, scratch_operands = 0 : i64, tpu.core_type = #tpu.core_type<tc>, window_params = [{transform_indices = @transform_0, window_bounds = array<i64: 1, 4, 256>}, {pipeline_mode = #tpu.pipeline_mode<synchronous>, transform_indices = @transform_1, window_bounds = array<i64: 4, 4>}, {pipeline_mode = #tpu.pipeline_mode<synchronous>, transform_indices = @transform_2, window_bounds = array<i64: 4, 1>}, {transform_indices = @transform_3, window_bounds = array<i64: 1, 4, 256>}]} {
    %c0 = arith.constant 0 : index
    %c0_0 = arith.constant 0 : index
    %0 = vector.load %arg2[%c0, %c0_0] : memref<4x4xbf16, #tpu.memory_space<vmem>>, vector<4x4xbf16>
    %c0_1 = arith.constant 0 : index
    %c0_2 = arith.constant 0 : index
    %c0_3 = arith.constant 0 : index
    %1 = vector.load %arg1[%c0_1, %c0_2, %c0_3] : memref<1x4x256xbf16, #tpu.memory_space<vmem>>, vector<1x4x256xbf16>
    %2 = vector.shape_cast %1 : vector<1x4x256xbf16> to vector<4x256xbf16>
    %cst = arith.constant dense<0.000000e+00> : vector<4x256xf32>
    %3 = tpu.matmul %0, %2, %cst {dimension_numbers = #tpu.dot_dimension_numbers<[1], [0], [0], [1], [0, 0, 1, 1], [], []>} : vector<4x4xbf16>, vector<4x256xbf16>, vector<4x256xf32> -> vector<4x256xf32>
    %c0_4 = arith.constant 0 : index
    %c0_5 = arith.constant 0 : index
    %4 = vector.load %arg3[%c0_4, %c0_5] : memref<4x1xf32, #tpu.memory_space<vmem>>, vector<4x1xf32>
    %5 = vector.broadcast %4 : vector<4x1xf32> to vector<4x256xf32>
    %6 = arith.addf %3, %5 : vector<4x256xf32>
    %cst_6 = arith.constant 0.000000e+00 : f32
    %7 = vector.broadcast %cst_6 : f32 to vector<4x256xf32>
    %8 = arith.maximumf %6, %7 : vector<4x256xf32>
    %9 = arith.truncf %8 : vector<4x256xf32> to vector<4x256xbf16>
    %c0_7 = arith.constant 0 : index
    %c0_8 = arith.constant 0 : index
    %c0_9 = arith.constant 0 : index
    %10 = vector.load %arg4[%c0_7, %c0_8, %c0_9] : memref<1x4x256xbf16, #tpu.memory_space<vmem>>, vector<1x4x256xbf16>
    %11 = vector.shape_cast %10 : vector<1x4x256xbf16> to vector<4x256xbf16>
    %12 = vector.shape_cast %9 : vector<4x256xbf16> to vector<1x4x256xbf16>
    tpu.vector_store %arg4[%c0_7, %c0_8, %c0_9], %12 {strides = array<i32>} : memref<1x4x256xbf16, #tpu.memory_space<vmem>>, vector<1x4x256xbf16>,
    return
  }
  func.func @transform_0(%arg0: i32) -> (i32, i32, i32) {
    %c0_i32 = arith.constant 0 : i32
    %c0_i32_0 = arith.constant 0 : i32
    %c0_i32_1 = arith.constant 0 : i32
    return %arg0, %c0_i32, %c0_i32_0 : i32, i32, i32
  }
  func.func @transform_1(%arg0: i32) -> (i32, i32) {
    %c0_i32 = arith.constant 0 : i32
    %c0_i32_0 = arith.constant 0 : i32
    %c0_i32_1 = arith.constant 0 : i32
    return %c0_i32, %c0_i32_0 : i32, i32
  }
  func.func @transform_2(%arg0: i32) -> (i32, i32) {
    %c0_i32 = arith.constant 0 : i32
    %c0_i32_0 = arith.constant 0 : i32
    %c0_i32_1 = arith.constant 0 : i32
    return %c0_i32, %c0_i32_0 : i32, i32
  }
  func.func @transform_3(%arg0: i32) -> (i32, i32, i32) {
    %c0_i32 = arith.constant 0 : i32
    %c0_i32_0 = arith.constant 0 : i32
    %c0_i32_1 = arith.constant 0 : i32
    return %arg0, %c0_i32, %c0_i32_0 : i32, i32, i32
  }
}

module attributes {stable_mosaic.version = 11 : i64} {
  func.func @_fourier_unit_kernel(%arg0: i32, %arg1: memref<1x4x256xbf16, #tpu.memory_space<vmem>>, %arg2: memref<256x144xf32, #tpu.memory_space<vmem>>, %arg3: memref<256x144xf32, #tpu.memory_space<vmem>>, %arg4: memref<4x4xbf16, #tpu.memory_space<vmem>>, %arg5: memref<4x4xbf16, #tpu.memory_space<vmem>>, %arg6: memref<4x4xbf16, #tpu.memory_space<vmem>>, %arg7: memref<4x4xbf16, #tpu.memory_space<vmem>>, %arg8: memref<4x1xf32, #tpu.memory_space<vmem>>, %arg9: memref<4x1xf32, #tpu.memory_space<vmem>>, %arg10: memref<144x256xf32, #tpu.memory_space<vmem>>, %arg11: memref<144x256xf32, #tpu.memory_space<vmem>>, %arg12: memref<1x4x256xbf16, #tpu.memory_space<vmem>>) attributes {dimension_semantics = [#tpu.dimension_semantics<parallel>], iteration_bounds = array<i64: 2>, scalar_prefetch = 0 : i64, scratch_operands = 0 : i64, tpu.core_type = #tpu.core_type<tc>, window_params = [{transform_indices = @transform_0, window_bounds = array<i64: 1, 4, 256>}, {pipeline_mode = #tpu.pipeline_mode<synchronous>, transform_indices = @transform_1, window_bounds = array<i64: 256, 144>}, {pipeline_mode = #tpu.pipeline_mode<synchronous>, transform_indices = @transform_2, window_bounds = array<i64: 256, 144>}, {pipeline_mode = #tpu.pipeline_mode<synchronous>, transform_indices = @transform_3, window_bounds = array<i64: 4, 4>}, {pipeline_mode = #tpu.pipeline_mode<synchronous>, transform_indices = @transform_4, window_bounds = array<i64: 4, 4>}, {pipeline_mode = #tpu.pipeline_mode<synchronous>, transform_indices = @transform_5, window_bounds = array<i64: 4, 4>}, {pipeline_mode = #tpu.pipeline_mode<synchronous>, transform_indices = @transform_6, window_bounds = array<i64: 4, 4>}, {pipeline_mode = #tpu.pipeline_mode<synchronous>, transform_indices = @transform_7, window_bounds = array<i64: 4, 1>}, {pipeline_mode = #tpu.pipeline_mode<synchronous>, transform_indices = @transform_8, window_bounds = array<i64: 4, 1>}, {pipeline_mode = #tpu.pipeline_mode<synchronous>, transform_indices = @transform_9, window_bounds = array<i64: 144, 256>}, {pipeline_mode = #tpu.pipeline_mode<synchronous>, transform_indices = @transform_10, window_bounds = array<i64: 144, 256>}, {transform_indices = @transform_11, window_bounds = array<i64: 1, 4, 256>}]} {
    %c0 = arith.constant 0 : index
    %c0_0 = arith.constant 0 : index
    %c0_1 = arith.constant 0 : index
    %0 = vector.load %arg1[%c0, %c0_0, %c0_1] : memref<1x4x256xbf16, #tpu.memory_space<vmem>>, vector<1x4x256xbf16>
    %1 = vector.shape_cast %0 : vector<1x4x256xbf16> to vector<4x256xbf16>
    %2 = arith.extf %1 : vector<4x256xbf16> to vector<4x256xf32>
    %c0_2 = arith.constant 0 : index
    %c0_3 = arith.constant 0 : index
    %3 = vector.load %arg2[%c0_2, %c0_3] : memref<256x144xf32, #tpu.memory_space<vmem>>, vector<256x144xf32>
    %cst = arith.constant dense<0.000000e+00> : vector<4x144xf32>
    %4 = tpu.matmul %2, %3, %cst {dimension_numbers = #tpu.dot_dimension_numbers<[1], [0], [0], [1], [0, 0, 1, 1], [], []>} : vector<4x256xf32>, vector<256x144xf32>, vector<4x144xf32> -> vector<4x144xf32>
    %c0_4 = arith.constant 0 : index
    %c0_5 = arith.constant 0 : index
    %5 = vector.load %arg3[%c0_4, %c0_5] : memref<256x144xf32, #tpu.memory_space<vmem>>, vector<256x144xf32>
    %cst_6 = arith.constant dense<0.000000e+00> : vector<4x144xf32>
    %6 = tpu.matmul %2, %5, %cst_6 {dimension_numbers = #tpu.dot_dimension_numbers<[1], [0], [0], [1], [0, 0, 1, 1], [], []>} : vector<4x256xf32>, vector<256x144xf32>, vector<4x144xf32> -> vector<4x144xf32>
    %7 = arith.truncf %4 : vector<4x144xf32> to vector<4x144xbf16>
    %8 = arith.truncf %6 : vector<4x144xf32> to vector<4x144xbf16>
    %c0_7 = arith.constant 0 : index
    %c0_8 = arith.constant 0 : index
    %9 = vector.load %arg4[%c0_7, %c0_8] : memref<4x4xbf16, #tpu.memory_space<vmem>>, vector<4x4xbf16>
    %cst_9 = arith.constant dense<0.000000e+00> : vector<4x144xf32>
    %10 = tpu.matmul %9, %7, %cst_9 {dimension_numbers = #tpu.dot_dimension_numbers<[1], [0], [0], [1], [0, 0, 1, 1], [], []>} : vector<4x4xbf16>, vector<4x144xbf16>, vector<4x144xf32> -> vector<4x144xf32>
    %c0_10 = arith.constant 0 : index
    %c0_11 = arith.constant 0 : index
    %11 = vector.load %arg5[%c0_10, %c0_11] : memref<4x4xbf16, #tpu.memory_space<vmem>>, vector<4x4xbf16>
    %cst_12 = arith.constant dense<0.000000e+00> : vector<4x144xf32>
    %12 = tpu.matmul %11, %8, %cst_12 {dimension_numbers = #tpu.dot_dimension_numbers<[1], [0], [0], [1], [0, 0, 1, 1], [], []>} : vector<4x4xbf16>, vector<4x144xbf16>, vector<4x144xf32> -> vector<4x144xf32>
    %13 = arith.addf %10, %12 : vector<4x144xf32>
    %c0_13 = arith.constant 0 : index
    %c0_14 = arith.constant 0 : index
    %14 = vector.load %arg8[%c0_13, %c0_14] : memref<4x1xf32, #tpu.memory_space<vmem>>, vector<4x1xf32>
    %15 = vector.broadcast %14 : vector<4x1xf32> to vector<4x144xf32>
    %16 = arith.addf %13, %15 : vector<4x144xf32>
    %c0_15 = arith.constant 0 : index
    %c0_16 = arith.constant 0 : index
    %17 = vector.load %arg6[%c0_15, %c0_16] : memref<4x4xbf16, #tpu.memory_space<vmem>>, vector<4x4xbf16>
    %cst_17 = arith.constant dense<0.000000e+00> : vector<4x144xf32>
    %18 = tpu.matmul %17, %7, %cst_17 {dimension_numbers = #tpu.dot_dimension_numbers<[1], [0], [0], [1], [0, 0, 1, 1], [], []>} : vector<4x4xbf16>, vector<4x144xbf16>, vector<4x144xf32> -> vector<4x144xf32>
    %c0_18 = arith.constant 0 : index
    %c0_19 = arith.constant 0 : index
    %19 = vector.load %arg7[%c0_18, %c0_19] : memref<4x4xbf16, #tpu.memory_space<vmem>>, vector<4x4xbf16>
    %cst_20 = arith.constant dense<0.000000e+00> : vector<4x144xf32>
    %20 = tpu.matmul %19, %8, %cst_20 {dimension_numbers = #tpu.dot_dimension_numbers<[1], [0], [0], [1], [0, 0, 1, 1], [], []>} : vector<4x4xbf16>, vector<4x144xbf16>, vector<4x144xf32> -> vector<4x144xf32>
    %21 = arith.addf %18, %20 : vector<4x144xf32>
    %c0_21 = arith.constant 0 : index
    %c0_22 = arith.constant 0 : index
    %22 = vector.load %arg9[%c0_21, %c0_22] : memref<4x1xf32, #tpu.memory_space<vmem>>, vector<4x1xf32>
    %23 = vector.broadcast %22 : vector<4x1xf32> to vector<4x144xf32>
    %24 = arith.addf %21, %23 : vector<4x144xf32>
    %cst_23 = arith.constant 0.000000e+00 : f32
    %25 = vector.broadcast %cst_23 : f32 to vector<4x144xf32>
    %26 = arith.maximumf %16, %25 : vector<4x144xf32>
    %cst_24 = arith.constant 0.000000e+00 : f32
    %27 = vector.broadcast %cst_24 : f32 to vector<4x144xf32>
    %28 = arith.maximumf %24, %27 : vector<4x144xf32>
    %c0_25 = arith.constant 0 : index
    %c0_26 = arith.constant 0 : index
    %29 = vector.load %arg10[%c0_25, %c0_26] : memref<144x256xf32, #tpu.memory_space<vmem>>, vector<144x256xf32>
    %cst_27 = arith.constant dense<0.000000e+00> : vector<4x256xf32>
    %30 = tpu.matmul %26, %29, %cst_27 {dimension_numbers = #tpu.dot_dimension_numbers<[1], [0], [0], [1], [0, 0, 1, 1], [], []>} : vector<4x144xf32>, vector<144x256xf32>, vector<4x256xf32> -> vector<4x256xf32>
    %c0_28 = arith.constant 0 : index
    %c0_29 = arith.constant 0 : index
    %31 = vector.load %arg11[%c0_28, %c0_29] : memref<144x256xf32, #tpu.memory_space<vmem>>, vector<144x256xf32>
    %cst_30 = arith.constant dense<0.000000e+00> : vector<4x256xf32>
    %32 = tpu.matmul %28, %31, %cst_30 {dimension_numbers = #tpu.dot_dimension_numbers<[1], [0], [0], [1], [0, 0, 1, 1], [], []>} : vector<4x144xf32>, vector<144x256xf32>, vector<4x256xf32> -> vector<4x256xf32>
    %33 = arith.addf %30, %32 : vector<4x256xf32>
    %34 = arith.truncf %33 : vector<4x256xf32> to vector<4x256xbf16>
    %c0_31 = arith.constant 0 : index
    %c0_32 = arith.constant 0 : index
    %c0_33 = arith.constant 0 : index
    %35 = vector.load %arg12[%c0_31, %c0_32, %c0_33] : memref<1x4x256xbf16, #tpu.memory_space<vmem>>, vector<1x4x256xbf16>
    %36 = vector.shape_cast %35 : vector<1x4x256xbf16> to vector<4x256xbf16>
    %37 = vector.shape_cast %34 : vector<4x256xbf16> to vector<1x4x256xbf16>
    tpu.vector_store %arg12[%c0_31, %c0_32, %c0_33], %37 {strides = array<i32>} : memref<1x4x256xbf16, #tpu.memory_space<vmem>>, vector<1x4x256xbf16>,
    return
  }
  func.func @transform_0(%arg0: i32) -> (i32, i32, i32) {
    %c0_i32 = arith.constant 0 : i32
    %c0_i32_0 = arith.constant 0 : i32
    %c0_i32_1 = arith.constant 0 : i32
    return %arg0, %c0_i32, %c0_i32_0 : i32, i32, i32
  }
  func.func @transform_1(%arg0: i32) -> (i32, i32) {
    %c0_i32 = arith.constant 0 : i32
    %c0_i32_0 = arith.constant 0 : i32
    %c0_i32_1 = arith.constant 0 : i32
    return %c0_i32, %c0_i32_0 : i32, i32
  }
  func.func @transform_2(%arg0: i32) -> (i32, i32) {
    %c0_i32 = arith.constant 0 : i32
    %c0_i32_0 = arith.constant 0 : i32
    %c0_i32_1 = arith.constant 0 : i32
    return %c0_i32, %c0_i32_0 : i32, i32
  }
  func.func @transform_3(%arg0: i32) -> (i32, i32) {
    %c0_i32 = arith.constant 0 : i32
    %c0_i32_0 = arith.constant 0 : i32
    %c0_i32_1 = arith.constant 0 : i32
    return %c0_i32, %c0_i32_0 : i32, i32
  }
  func.func @transform_4(%arg0: i32) -> (i32, i32) {
    %c0_i32 = arith.constant 0 : i32
    %c0_i32_0 = arith.constant 0 : i32
    %c0_i32_1 = arith.constant 0 : i32
    return %c0_i32, %c0_i32_0 : i32, i32
  }
  func.func @transform_5(%arg0: i32) -> (i32, i32) {
    %c0_i32 = arith.constant 0 : i32
    %c0_i32_0 = arith.constant 0 : i32
    %c0_i32_1 = arith.constant 0 : i32
    return %c0_i32, %c0_i32_0 : i32, i32
  }
  func.func @transform_6(%arg0: i32) -> (i32, i32) {
    %c0_i32 = arith.constant 0 : i32
    %c0_i32_0 = arith.constant 0 : i32
    %c0_i32_1 = arith.constant 0 : i32
    return %c0_i32, %c0_i32_0 : i32, i32
  }
  func.func @transform_7(%arg0: i32) -> (i32, i32) {
    %c0_i32 = arith.constant 0 : i32
    %c0_i32_0 = arith.constant 0 : i32
    %c0_i32_1 = arith.constant 0 : i32
    return %c0_i32, %c0_i32_0 : i32, i32
  }
  func.func @transform_8(%arg0: i32) -> (i32, i32) {
    %c0_i32 = arith.constant 0 : i32
    %c0_i32_0 = arith.constant 0 : i32
    %c0_i32_1 = arith.constant 0 : i32
    return %c0_i32, %c0_i32_0 : i32, i32
  }
  func.func @transform_9(%arg0: i32) -> (i32, i32) {
    %c0_i32 = arith.constant 0 : i32
    %c0_i32_0 = arith.constant 0 : i32
    %c0_i32_1 = arith.constant 0 : i32
    return %c0_i32, %c0_i32_0 : i32, i32
  }
  func.func @transform_10(%arg0: i32) -> (i32, i32) {
    %c0_i32 = arith.constant 0 : i32
    %c0_i32_0 = arith.constant 0 : i32
    %c0_i32_1 = arith.constant 0 : i32
    return %c0_i32, %c0_i32_0 : i32, i32
  }
  func.func @transform_11(%arg0: i32) -> (i32, i32, i32) {
    %c0_i32 = arith.constant 0 : i32
    %c0_i32_0 = arith.constant 0 : i32
    %c0_i32_1 = arith.constant 0 : i32
    return %arg0, %c0_i32, %c0_i32_0 : i32, i32, i32
  }
}

module attributes {stable_mosaic.version = 11 : i64} {
  func.func @_fourier_unit_kernel(%arg0: i32, %arg1: memref<1x4x64xbf16, #tpu.memory_space<vmem>>, %arg2: memref<64x40xf32, #tpu.memory_space<vmem>>, %arg3: memref<64x40xf32, #tpu.memory_space<vmem>>, %arg4: memref<4x4xbf16, #tpu.memory_space<vmem>>, %arg5: memref<4x4xbf16, #tpu.memory_space<vmem>>, %arg6: memref<4x4xbf16, #tpu.memory_space<vmem>>, %arg7: memref<4x4xbf16, #tpu.memory_space<vmem>>, %arg8: memref<4x1xf32, #tpu.memory_space<vmem>>, %arg9: memref<4x1xf32, #tpu.memory_space<vmem>>, %arg10: memref<40x256xf32, #tpu.memory_space<vmem>>, %arg11: memref<40x256xf32, #tpu.memory_space<vmem>>, %arg12: memref<1x4x256xbf16, #tpu.memory_space<vmem>>) attributes {dimension_semantics = [#tpu.dimension_semantics<parallel>], iteration_bounds = array<i64: 2>, scalar_prefetch = 0 : i64, scratch_operands = 0 : i64, tpu.core_type = #tpu.core_type<tc>, window_params = [{transform_indices = @transform_0, window_bounds = array<i64: 1, 4, 64>}, {pipeline_mode = #tpu.pipeline_mode<synchronous>, transform_indices = @transform_1, window_bounds = array<i64: 64, 40>}, {pipeline_mode = #tpu.pipeline_mode<synchronous>, transform_indices = @transform_2, window_bounds = array<i64: 64, 40>}, {pipeline_mode = #tpu.pipeline_mode<synchronous>, transform_indices = @transform_3, window_bounds = array<i64: 4, 4>}, {pipeline_mode = #tpu.pipeline_mode<synchronous>, transform_indices = @transform_4, window_bounds = array<i64: 4, 4>}, {pipeline_mode = #tpu.pipeline_mode<synchronous>, transform_indices = @transform_5, window_bounds = array<i64: 4, 4>}, {pipeline_mode = #tpu.pipeline_mode<synchronous>, transform_indices = @transform_6, window_bounds = array<i64: 4, 4>}, {pipeline_mode = #tpu.pipeline_mode<synchronous>, transform_indices = @transform_7, window_bounds = array<i64: 4, 1>}, {pipeline_mode = #tpu.pipeline_mode<synchronous>, transform_indices = @transform_8, window_bounds = array<i64: 4, 1>}, {pipeline_mode = #tpu.pipeline_mode<synchronous>, transform_indices = @transform_9, window_bounds = array<i64: 40, 256>}, {pipeline_mode = #tpu.pipeline_mode<synchronous>, transform_indices = @transform_10, window_bounds = array<i64: 40, 256>}, {transform_indices = @transform_11, window_bounds = array<i64: 1, 4, 256>}]} {
    %c0 = arith.constant 0 : index
    %c0_0 = arith.constant 0 : index
    %c0_1 = arith.constant 0 : index
    %0 = vector.load %arg1[%c0, %c0_0, %c0_1] : memref<1x4x64xbf16, #tpu.memory_space<vmem>>, vector<1x4x64xbf16>
    %1 = vector.shape_cast %0 : vector<1x4x64xbf16> to vector<4x64xbf16>
    %2 = arith.extf %1 : vector<4x64xbf16> to vector<4x64xf32>
    %c0_2 = arith.constant 0 : index
    %c0_3 = arith.constant 0 : index
    %3 = vector.load %arg2[%c0_2, %c0_3] : memref<64x40xf32, #tpu.memory_space<vmem>>, vector<64x40xf32>
    %cst = arith.constant dense<0.000000e+00> : vector<4x40xf32>
    %4 = tpu.matmul %2, %3, %cst {dimension_numbers = #tpu.dot_dimension_numbers<[1], [0], [0], [1], [0, 0, 1, 1], [], []>} : vector<4x64xf32>, vector<64x40xf32>, vector<4x40xf32> -> vector<4x40xf32>
    %c0_4 = arith.constant 0 : index
    %c0_5 = arith.constant 0 : index
    %5 = vector.load %arg3[%c0_4, %c0_5] : memref<64x40xf32, #tpu.memory_space<vmem>>, vector<64x40xf32>
    %cst_6 = arith.constant dense<0.000000e+00> : vector<4x40xf32>
    %6 = tpu.matmul %2, %5, %cst_6 {dimension_numbers = #tpu.dot_dimension_numbers<[1], [0], [0], [1], [0, 0, 1, 1], [], []>} : vector<4x64xf32>, vector<64x40xf32>, vector<4x40xf32> -> vector<4x40xf32>
    %7 = arith.truncf %4 : vector<4x40xf32> to vector<4x40xbf16>
    %8 = arith.truncf %6 : vector<4x40xf32> to vector<4x40xbf16>
    %c0_7 = arith.constant 0 : index
    %c0_8 = arith.constant 0 : index
    %9 = vector.load %arg4[%c0_7, %c0_8] : memref<4x4xbf16, #tpu.memory_space<vmem>>, vector<4x4xbf16>
    %cst_9 = arith.constant dense<0.000000e+00> : vector<4x40xf32>
    %10 = tpu.matmul %9, %7, %cst_9 {dimension_numbers = #tpu.dot_dimension_numbers<[1], [0], [0], [1], [0, 0, 1, 1], [], []>} : vector<4x4xbf16>, vector<4x40xbf16>, vector<4x40xf32> -> vector<4x40xf32>
    %c0_10 = arith.constant 0 : index
    %c0_11 = arith.constant 0 : index
    %11 = vector.load %arg5[%c0_10, %c0_11] : memref<4x4xbf16, #tpu.memory_space<vmem>>, vector<4x4xbf16>
    %cst_12 = arith.constant dense<0.000000e+00> : vector<4x40xf32>
    %12 = tpu.matmul %11, %8, %cst_12 {dimension_numbers = #tpu.dot_dimension_numbers<[1], [0], [0], [1], [0, 0, 1, 1], [], []>} : vector<4x4xbf16>, vector<4x40xbf16>, vector<4x40xf32> -> vector<4x40xf32>
    %13 = arith.addf %10, %12 : vector<4x40xf32>
    %c0_13 = arith.constant 0 : index
    %c0_14 = arith.constant 0 : index
    %14 = vector.load %arg8[%c0_13, %c0_14] : memref<4x1xf32, #tpu.memory_space<vmem>>, vector<4x1xf32>
    %15 = vector.broadcast %14 : vector<4x1xf32> to vector<4x40xf32>
    %16 = arith.addf %13, %15 : vector<4x40xf32>
    %c0_15 = arith.constant 0 : index
    %c0_16 = arith.constant 0 : index
    %17 = vector.load %arg6[%c0_15, %c0_16] : memref<4x4xbf16, #tpu.memory_space<vmem>>, vector<4x4xbf16>
    %cst_17 = arith.constant dense<0.000000e+00> : vector<4x40xf32>
    %18 = tpu.matmul %17, %7, %cst_17 {dimension_numbers = #tpu.dot_dimension_numbers<[1], [0], [0], [1], [0, 0, 1, 1], [], []>} : vector<4x4xbf16>, vector<4x40xbf16>, vector<4x40xf32> -> vector<4x40xf32>
    %c0_18 = arith.constant 0 : index
    %c0_19 = arith.constant 0 : index
    %19 = vector.load %arg7[%c0_18, %c0_19] : memref<4x4xbf16, #tpu.memory_space<vmem>>, vector<4x4xbf16>
    %cst_20 = arith.constant dense<0.000000e+00> : vector<4x40xf32>
    %20 = tpu.matmul %19, %8, %cst_20 {dimension_numbers = #tpu.dot_dimension_numbers<[1], [0], [0], [1], [0, 0, 1, 1], [], []>} : vector<4x4xbf16>, vector<4x40xbf16>, vector<4x40xf32> -> vector<4x40xf32>
    %21 = arith.addf %18, %20 : vector<4x40xf32>
    %c0_21 = arith.constant 0 : index
    %c0_22 = arith.constant 0 : index
    %22 = vector.load %arg9[%c0_21, %c0_22] : memref<4x1xf32, #tpu.memory_space<vmem>>, vector<4x1xf32>
    %23 = vector.broadcast %22 : vector<4x1xf32> to vector<4x40xf32>
    %24 = arith.addf %21, %23 : vector<4x40xf32>
    %cst_23 = arith.constant 0.000000e+00 : f32
    %25 = vector.broadcast %cst_23 : f32 to vector<4x40xf32>
    %26 = arith.maximumf %16, %25 : vector<4x40xf32>
    %cst_24 = arith.constant 0.000000e+00 : f32
    %27 = vector.broadcast %cst_24 : f32 to vector<4x40xf32>
    %28 = arith.maximumf %24, %27 : vector<4x40xf32>
    %c0_25 = arith.constant 0 : index
    %c0_26 = arith.constant 0 : index
    %29 = vector.load %arg10[%c0_25, %c0_26] : memref<40x256xf32, #tpu.memory_space<vmem>>, vector<40x256xf32>
    %cst_27 = arith.constant dense<0.000000e+00> : vector<4x256xf32>
    %30 = tpu.matmul %26, %29, %cst_27 {dimension_numbers = #tpu.dot_dimension_numbers<[1], [0], [0], [1], [0, 0, 1, 1], [], []>} : vector<4x40xf32>, vector<40x256xf32>, vector<4x256xf32> -> vector<4x256xf32>
    %c0_28 = arith.constant 0 : index
    %c0_29 = arith.constant 0 : index
    %31 = vector.load %arg11[%c0_28, %c0_29] : memref<40x256xf32, #tpu.memory_space<vmem>>, vector<40x256xf32>
    %cst_30 = arith.constant dense<0.000000e+00> : vector<4x256xf32>
    %32 = tpu.matmul %28, %31, %cst_30 {dimension_numbers = #tpu.dot_dimension_numbers<[1], [0], [0], [1], [0, 0, 1, 1], [], []>} : vector<4x40xf32>, vector<40x256xf32>, vector<4x256xf32> -> vector<4x256xf32>
    %33 = arith.addf %30, %32 : vector<4x256xf32>
    %34 = arith.truncf %33 : vector<4x256xf32> to vector<4x256xbf16>
    %c0_31 = arith.constant 0 : index
    %c0_32 = arith.constant 0 : index
    %c0_33 = arith.constant 0 : index
    %35 = vector.load %arg12[%c0_31, %c0_32, %c0_33] : memref<1x4x256xbf16, #tpu.memory_space<vmem>>, vector<1x4x256xbf16>
    %36 = vector.shape_cast %35 : vector<1x4x256xbf16> to vector<4x256xbf16>
    %37 = vector.shape_cast %34 : vector<4x256xbf16> to vector<1x4x256xbf16>
    tpu.vector_store %arg12[%c0_31, %c0_32, %c0_33], %37 {strides = array<i32>} : memref<1x4x256xbf16, #tpu.memory_space<vmem>>, vector<1x4x256xbf16>,
    return
  }
  func.func @transform_0(%arg0: i32) -> (i32, i32, i32) {
    %c0_i32 = arith.constant 0 : i32
    %c0_i32_0 = arith.constant 0 : i32
    %c0_i32_1 = arith.constant 0 : i32
    return %arg0, %c0_i32, %c0_i32_0 : i32, i32, i32
  }
  func.func @transform_1(%arg0: i32) -> (i32, i32) {
    %c0_i32 = arith.constant 0 : i32
    %c0_i32_0 = arith.constant 0 : i32
    %c0_i32_1 = arith.constant 0 : i32
    return %c0_i32, %c0_i32_0 : i32, i32
  }
  func.func @transform_2(%arg0: i32) -> (i32, i32) {
    %c0_i32 = arith.constant 0 : i32
    %c0_i32_0 = arith.constant 0 : i32
    %c0_i32_1 = arith.constant 0 : i32
    return %c0_i32, %c0_i32_0 : i32, i32
  }
  func.func @transform_3(%arg0: i32) -> (i32, i32) {
    %c0_i32 = arith.constant 0 : i32
    %c0_i32_0 = arith.constant 0 : i32
    %c0_i32_1 = arith.constant 0 : i32
    return %c0_i32, %c0_i32_0 : i32, i32
  }
  func.func @transform_4(%arg0: i32) -> (i32, i32) {
    %c0_i32 = arith.constant 0 : i32
    %c0_i32_0 = arith.constant 0 : i32
    %c0_i32_1 = arith.constant 0 : i32
    return %c0_i32, %c0_i32_0 : i32, i32
  }
  func.func @transform_5(%arg0: i32) -> (i32, i32) {
    %c0_i32 = arith.constant 0 : i32
    %c0_i32_0 = arith.constant 0 : i32
    %c0_i32_1 = arith.constant 0 : i32
    return %c0_i32, %c0_i32_0 : i32, i32
  }
  func.func @transform_6(%arg0: i32) -> (i32, i32) {
    %c0_i32 = arith.constant 0 : i32
    %c0_i32_0 = arith.constant 0 : i32
    %c0_i32_1 = arith.constant 0 : i32
    return %c0_i32, %c0_i32_0 : i32, i32
  }
  func.func @transform_7(%arg0: i32) -> (i32, i32) {
    %c0_i32 = arith.constant 0 : i32
    %c0_i32_0 = arith.constant 0 : i32
    %c0_i32_1 = arith.constant 0 : i32
    return %c0_i32, %c0_i32_0 : i32, i32
  }
  func.func @transform_8(%arg0: i32) -> (i32, i32) {
    %c0_i32 = arith.constant 0 : i32
    %c0_i32_0 = arith.constant 0 : i32
    %c0_i32_1 = arith.constant 0 : i32
    return %c0_i32, %c0_i32_0 : i32, i32
  }
  func.func @transform_9(%arg0: i32) -> (i32, i32) {
    %c0_i32 = arith.constant 0 : i32
    %c0_i32_0 = arith.constant 0 : i32
    %c0_i32_1 = arith.constant 0 : i32
    return %c0_i32, %c0_i32_0 : i32, i32
  }
  func.func @transform_10(%arg0: i32) -> (i32, i32) {
    %c0_i32 = arith.constant 0 : i32
    %c0_i32_0 = arith.constant 0 : i32
    %c0_i32_1 = arith.constant 0 : i32
    return %c0_i32, %c0_i32_0 : i32, i32
  }
  func.func @transform_11(%arg0: i32) -> (i32, i32, i32) {
    %c0_i32 = arith.constant 0 : i32
    %c0_i32_0 = arith.constant 0 : i32
    %c0_i32_1 = arith.constant 0 : i32
    return %arg0, %c0_i32, %c0_i32_0 : i32, i32, i32
  }
}

module attributes {stable_mosaic.version = 11 : i64} {
  func.func @kernel(%arg0: i32, %arg1: memref<1x4x256xbf16, #tpu.memory_space<vmem>>, %arg2: memref<1x4x256xbf16, #tpu.memory_space<vmem>>, %arg3: memref<1x4x256xbf16, #tpu.memory_space<vmem>>, %arg4: memref<8x4xbf16, #tpu.memory_space<vmem>>, %arg5: memref<1x8x256xf32, #tpu.memory_space<vmem>>) attributes {dimension_semantics = [#tpu.dimension_semantics<parallel>], iteration_bounds = array<i64: 2>, scalar_prefetch = 0 : i64, scratch_operands = 0 : i64, tpu.core_type = #tpu.core_type<tc>, window_params = [{transform_indices = @transform_0, window_bounds = array<i64: 1, 4, 256>}, {transform_indices = @transform_1, window_bounds = array<i64: 1, 4, 256>}, {transform_indices = @transform_2, window_bounds = array<i64: 1, 4, 256>}, {pipeline_mode = #tpu.pipeline_mode<synchronous>, transform_indices = @transform_3, window_bounds = array<i64: 8, 4>}, {transform_indices = @transform_4, window_bounds = array<i64: 1, 8, 256>}]} {
    %c0 = arith.constant 0 : index
    %c0_0 = arith.constant 0 : index
    %c0_1 = arith.constant 0 : index
    %0 = vector.load %arg1[%c0, %c0_0, %c0_1] : memref<1x4x256xbf16, #tpu.memory_space<vmem>>, vector<1x4x256xbf16>
    %1 = vector.shape_cast %0 : vector<1x4x256xbf16> to vector<4x256xbf16>
    %2 = arith.extf %1 : vector<4x256xbf16> to vector<4x256xf32>
    %c0_2 = arith.constant 0 : index
    %c0_3 = arith.constant 0 : index
    %c0_4 = arith.constant 0 : index
    %3 = vector.load %arg2[%c0_2, %c0_3, %c0_4] : memref<1x4x256xbf16, #tpu.memory_space<vmem>>, vector<1x4x256xbf16>
    %4 = vector.shape_cast %3 : vector<1x4x256xbf16> to vector<4x256xbf16>
    %5 = arith.extf %4 : vector<4x256xbf16> to vector<4x256xf32>
    %6 = arith.addf %2, %5 : vector<4x256xf32>
    %c0_5 = arith.constant 0 : index
    %c0_6 = arith.constant 0 : index
    %c0_7 = arith.constant 0 : index
    %7 = vector.load %arg3[%c0_5, %c0_6, %c0_7] : memref<1x4x256xbf16, #tpu.memory_space<vmem>>, vector<1x4x256xbf16>
    %8 = vector.shape_cast %7 : vector<1x4x256xbf16> to vector<4x256xbf16>
    %9 = arith.extf %8 : vector<4x256xbf16> to vector<4x256xf32>
    %10 = arith.addf %6, %9 : vector<4x256xf32>
    %c0_8 = arith.constant 0 : index
    %c0_9 = arith.constant 0 : index
    %11 = vector.load %arg4[%c0_8, %c0_9] : memref<8x4xbf16, #tpu.memory_space<vmem>>, vector<8x4xbf16>
    %12 = arith.truncf %10 : vector<4x256xf32> to vector<4x256xbf16>
    %cst = arith.constant dense<0.000000e+00> : vector<8x256xf32>
    %13 = tpu.matmul %11, %12, %cst {dimension_numbers = #tpu.dot_dimension_numbers<[1], [0], [0], [1], [0, 0, 1, 1], [], []>} : vector<8x4xbf16>, vector<4x256xbf16>, vector<8x256xf32> -> vector<8x256xf32>
    %c0_10 = arith.constant 0 : index
    %c0_11 = arith.constant 0 : index
    %c0_12 = arith.constant 0 : index
    %14 = vector.load %arg5[%c0_10, %c0_11, %c0_12] : memref<1x8x256xf32, #tpu.memory_space<vmem>>, vector<1x8x256xf32>
    %15 = vector.shape_cast %14 : vector<1x8x256xf32> to vector<8x256xf32>
    %16 = vector.shape_cast %13 : vector<8x256xf32> to vector<1x8x256xf32>
    tpu.vector_store %arg5[%c0_10, %c0_11, %c0_12], %16 {strides = array<i32>} : memref<1x8x256xf32, #tpu.memory_space<vmem>>, vector<1x8x256xf32>,
    return
  }
  func.func @transform_0(%arg0: i32) -> (i32, i32, i32) {
    %c0_i32 = arith.constant 0 : i32
    %c0_i32_0 = arith.constant 0 : i32
    %c0_i32_1 = arith.constant 0 : i32
    return %arg0, %c0_i32, %c0_i32_0 : i32, i32, i32
  }
  func.func @transform_1(%arg0: i32) -> (i32, i32, i32) {
    %c0_i32 = arith.constant 0 : i32
    %c0_i32_0 = arith.constant 0 : i32
    %c0_i32_1 = arith.constant 0 : i32
    return %arg0, %c0_i32, %c0_i32_0 : i32, i32, i32
  }
  func.func @transform_2(%arg0: i32) -> (i32, i32, i32) {
    %c0_i32 = arith.constant 0 : i32
    %c0_i32_0 = arith.constant 0 : i32
    %c0_i32_1 = arith.constant 0 : i32
    return %arg0, %c0_i32, %c0_i32_0 : i32, i32, i32
  }
  func.func @transform_3(%arg0: i32) -> (i32, i32) {
    %c0_i32 = arith.constant 0 : i32
    %c0_i32_0 = arith.constant 0 : i32
    %c0_i32_1 = arith.constant 0 : i32
    return %c0_i32, %c0_i32_0 : i32, i32
  }
  func.func @transform_4(%arg0: i32) -> (i32, i32, i32) {
    %c0_i32 = arith.constant 0 : i32
    %c0_i32_0 = arith.constant 0 : i32
    %c0_i32_1 = arith.constant 0 : i32
    return %arg0, %c0_i32, %c0_i32_0 : i32, i32, i32
  }
}

</mosaic_0001>

<bundles_post_ra>
// kernel: spectral_transform.4
= control target key start
LH: loop header
LB: loop body
LE: loop exit
PB: predicated region body
PF: predicated region fallthrough
CT: control target
= control target key end

     0   :  { %s369_s12 = smov 0   ;;  %s392_s0 = inlined_call_operand.vmem [shape: bf16[2,4,256], index: 0, kind: input, shape index: {}]   ;;  %s393_s1 = inlined_call_operand.vmem [shape: bf16[4,4], index: 1, kind: input, shape index: {}]   ;;  %s394_s2 = inlined_call_operand.vmem [shape: f32[4,1], index: 2, kind: input, shape index: {}]   ;;  %s395_s3 = inlined_call_operand.vmem [shape: bf16[2,4,256], index: 3, kind: output, shape index: {}]  }
   0x1 LB: > { %s312_s13 = sadd.s32 4294967295, %s346_s12   ;;  %p316_p0 = scmp.ge.s32.totalorder %s346_s12, 1  ;;  %s346_s12 = sphi %s369_s12, %s13_s12  }
   0x2   : > { %p137_p1 = scmp.lt.s32.totalorder %s346_s12, 3 }
   0x4   : > { %p138_p2 = pnand %p316_p0, %p137_p1 }
   0x5   : > { %p161_p3 = scmp.lt.s32.totalorder (!%p138_p2), %s312_s13, 1 }
   0x6   : > { %141 = sbr.rel (%p138_p2) target bundleno = 223 (0xdf), region = 32 }
   0xb   : > { %v348_v0 = vmov 0   ;;  %v174_v1 = vld [vmem:[%s394_s2] sm:$0xf]  ;;  %s397_s13 = smov (!%p161_p3, %s312_s13), 1  ;;  %vm193_vm0 = vcmask 1041408   ;;  %vm189_vm1 = vcmask 31744  }
   0xc   : > { %232 = vmatprep.mubr.bf16.mxu0 %v348_v0  ;;  %339 = vset.pattern.permute.xlu0 %v348_v0  ;;  %s328_s16 = sshll.u32 %s397_s13, 2  ;;  %v172_v5 = vld [vmem:[%s393_s1] sm:$0x3] }
   0xd   : > { %177 = vperm.xlu0 %339, %v174_v1   ;;  %s165_s19 = scalar_lea.vmem %s392_s0, %s328_s16  ;;  %s170_s24 = scalar_lea.vmem %s395_s3, %s328_s16 }
   0xe   : > { %v321_v2 = vld.sshfl [vmem:[%s165_s19] sm:$0x33 pattern:$0x76325410] }
   0xf   : > { %v188_v3 = vcombine.high %v321_v2, %v321_v2  ;;  %v195_v4 = vsel %vm193_vm0, %v321_v2, 0 }
  0x11   : > { %322 = vmatprep.subr.msk.bf16.mxu0 %vm193_vm0, %v188_v3 }
  0x12   : > { %215 = vmatpush1.bf16.msra.mxu0 %v195_v4 }
  0x15   : > { %323 = vmatmul.mubr.msk.bf16.vlgmr.msra.gmra.mxu0 %vm189_vm1, %v172_v5 }
  0x88   : > { %v178_v6 = vpop.permute.xlu0 %177 }
  0xd5   : > { %v234_v7 = vpop.f32.mrf.mxu0 }
  0xd6   : > { %v235_v8 = vadd.f32 %v234_v7, %v178_v6 }
  0xd7   : > { %v236_v9 = vpop.f32.mrf.mxu0 }
  0xd8   : > { %v237_v10 = vadd.f32 %v236_v9, %v178_v6  ;;  %v241_v12 = vmax.f32 %v235_v8, 0.0 }
  0xd9   : > { %v238_v11 = vpop.f32.mrf.mxu0 }
  0xda   : > { %v242_v13 = vmax.f32 %v237_v10, 0.0 }
  0xdb   : > { %v239_v14 = vpop.f32.mrf.mxu0 }
  0xdc   : > { %v324_v15 = vpack.c.bf16 %v242_v13, %v241_v12 }
  0xde   : > { %325 = vst.sshfl [vmem:[%s170_s24] sm:$0x33 pattern:$0x76325410] %v324_v15 }
  0xdf PF: > { %s13_s12 = sadd.s32 1, %s346_s12  }
  0xe0   : > { %p10_p4 = scmp.ge.s32.totalorder %s13_s12, 4  }
  0xe2   :  { %12 = sbr.rel (!%p10_p4) target bundleno = 1 (0x1), region = 62 }

// kernel: spectral_transform.5
= control target key start
LH: loop header
LB: loop body
LE: loop exit
PB: predicated region body
PF: predicated region fallthrough
CT: control target
= control target key end

     0   :  { %s1275_s17 = smov 0   ;;  %s1933_s0 = inlined_call_operand.vmem [shape: bf16[2,4,256], index: 0, kind: input, shape index: {}]   ;;  %s1934_s1 = inlined_call_operand.vmem [shape: f32[256,144], index: 1, kind: input, shape index: {}]   ;;  %s1935_s2 = inlined_call_operand.vmem [shape: f32[256,144], index: 2, kind: input, shape index: {}]   ;;  %s1936_s3 = inlined_call_operand.vmem [shape: bf16[4,4], index: 3, kind: input, shape index: {}]   ;;  %s1937_s4 = inlined_call_operand.vmem [shape: bf16[4,4], index: 4, kind: input, shape index: {}]   ;;  %s1938_s5 = inlined_call_operand.vmem [shape: bf16[4,4], index: 5, kind: input, shape index: {}]   ;;  %s1939_s6 = inlined_call_operand.vmem [shape: bf16[4,4], index: 6, kind: input, shape index: {}]   ;;  %s1940_s7 = inlined_call_operand.vmem [shape: f32[4,1], index: 7, kind: input, shape index: {}]   ;;  %s1941_s8 = inlined_call_operand.vmem [shape: f32[4,1], index: 8, kind: input, shape index: {}]   ;;  %s1942_s9 = inlined_call_operand.vmem [shape: f32[144,256], index: 9, kind: input, shape index: {}]   ;;  %s1943_s10 = inlined_call_operand.vmem [shape: f32[144,256], index: 10, kind: input, shape index: {}]   ;;  %s1944_s11 = inlined_call_operand.vmem [shape: bf16[2,4,256], index: 11, kind: output, shape index: {}]  }
   0x1 LB: > { %s1171_s18 = sadd.s32 4294967295, %s1212_s17   ;;  %p1175_p0 = scmp.ge.s32.totalorder %s1212_s17, 1  ;;  %s1212_s17 = sphi %s1275_s17, %s21_s17  }
   0x2   : > { %p337_p1 = scmp.lt.s32.totalorder %s1212_s17, 3 }
   0x4   : > { %p338_p2 = pnand %p1175_p0, %p337_p1 }
   0x5   : > { %p1537_p3 = scmp.lt.s32.totalorder (!%p338_p2), %s1171_s18, 1 }
   0x6   : > { %341 = sbr.rel (%p338_p2) target bundleno = 689 (0x2b1), region = 64 }
   0xb   : > { %v421_v0 = vld [vmem:[%s1934_s1 + $0xf8] sm:$0xff]  ;;  %v420_v2 = vld [vmem:[%s1934_s1 + $0xf0] sm:$0xff]  ;;  %v419_v4 = vld [vmem:[%s1934_s1 + $0xe8] sm:$0xff]  ;;  %s1947_s18 = smov (!%p1537_p3, %s1171_s18), 1  ;;  %vm673_vm0 = vcmask 1041408   ;;  %vm669_vm1 = vcmask 31744  }
   0xc   : > { %v559_v1 = vld [vmem:[%s1935_s2 + $0xf8] sm:$0xff]  ;;  %457 = vmatprep.subr.mxu0 %v421_v0  ;;  %v558_v3 = vld [vmem:[%s1935_s2 + $0xf0] sm:$0xff]  ;;  %v557_v5 = vld [vmem:[%s1935_s2 + $0xe8] sm:$0xff]  ;;  %s1194_s14 = sshll.u32 %s1947_s18, 2  ;;  %vm953_vm2 = vcmask 130048  }
   0xd   : > { %592 = vmatprep.subr.mxu1 %v559_v1  ;;  %458 = vmatpush1.msra.mxu0 %v420_v2  ;;  %v418_v6 = vld [vmem:[%s1934_s1 + $0xe0] sm:$0xff]  ;;  %v417_v8 = vld [vmem:[%s1934_s1 + $0xd8] sm:$0xff]  ;;  %v416_v10 = vld [vmem:[%s1934_s1 + $0xd0] sm:$0xff]  ;;  %s381_s12 = scalar_lea.vmem %s1933_s0, %s1194_s14  ;;  %s386_s26 = scalar_lea.vmem %s1944_s11, %s1194_s14 }
   0xe   : > { %593 = vmatpush1.msra.mxu1 %v558_v3  ;;  %v556_v7 = vld [vmem:[%s1935_s2 + $0xe0] sm:$0xff]  ;;  %459 = vmatprep.subr.mxu0 %v419_v4  ;;  %v555_v9 = vld [vmem:[%s1935_s2 + $0xd8] sm:$0xff]  ;;  %v554_v11 = vld [vmem:[%s1935_s2 + $0xd0] sm:$0xff] }
   0xf   : > { %594 = vmatprep.subr.mxu1 %v557_v5  ;;  %460 = vmatpush1.msra.mxu0 %v418_v6  ;;  %v415_v12 = vld [vmem:[%s1934_s1 + $0xc8] sm:$0xff]  ;;  %v414_v14 = vld [vmem:[%s1934_s1 + $0xc0] sm:$0xff]  ;;  %v413_v16 = vld [vmem:[%s1934_s1 + $0xb8] sm:$0xff] }
  0x10   : > { %595 = vmatpush1.msra.mxu1 %v556_v7  ;;  %v553_v13 = vld [vmem:[%s1935_s2 + $0xc8] sm:$0xff]  ;;  %461 = vmatprep.subr.mxu0 %v417_v8  ;;  %v552_v15 = vld [vmem:[%s1935_s2 + $0xc0] sm:$0xff]  ;;  %v551_v17 = vld [vmem:[%s1935_s2 + $0xb8] sm:$0xff] }
  0x11   : > { %596 = vmatprep.subr.mxu1 %v555_v9  ;;  %462 = vmatpush1.msra.mxu0 %v416_v10  ;;  %v412_v18 = vld [vmem:[%s1934_s1 + $0xb0] sm:$0xff]  ;;  %v411_v20 = vld [vmem:[%s1934_s1 + $0xa8] sm:$0xff]  ;;  %v410_v22 = vld [vmem:[%s1934_s1 + $0xa0] sm:$0xff] }
  0x12   : > { %597 = vmatpush1.msra.mxu1 %v554_v11  ;;  %463 = vmatprep.subr.mxu0 %v415_v12  ;;  %v550_v19 = vld [vmem:[%s1935_s2 + $0xb0] sm:$0xff]  ;;  %v549_v21 = vld [vmem:[%s1935_s2 + $0xa8] sm:$0xff]  ;;  %v548_v23 = vld [vmem:[%s1935_s2 + $0xa0] sm:$0xff] }
  0x13   : > { %598 = vmatprep.subr.mxu1 %v553_v13  ;;  %464 = vmatpush1.msra.mxu0 %v414_v14  ;;  %v409_v24 = vld [vmem:[%s1934_s1 + $0x98] sm:$0xff]  ;;  %v408_v26 = vld [vmem:[%s1934_s1 + $0x90] sm:$0xff]  ;;  %v407_v28 = vld [vmem:[%s1934_s1 + $0x88] sm:$0xff] }
  0x14   : > { %599 = vmatpush1.msra.mxu1 %v552_v15  ;;  %465 = vmatprep.subr.mxu0 %v413_v16  ;;  %v547_v25 = vld [vmem:[%s1935_s2 + $0x98] sm:$0xff]  ;;  %v546_v27 = vld [vmem:[%s1935_s2 + $0x90] sm:$0xff]  ;;  %v545_v29 = vld [vmem:[%s1935_s2 + $0x88] sm:$0xff] }
  0x15   : > { %600 = vmatprep.subr.mxu1 %v551_v17  ;;  %466 = vmatpush1.msra.mxu0 %v412_v18  ;;  %v406_v30 = vld [vmem:[%s1934_s1 + $0x80] sm:$0xff]  ;;  %v405_v32 = vld [vmem:[%s1934_s1 + $0x78] sm:$0xff]  ;;  %v404_v34 = vld [vmem:[%s1934_s1 + $0x70] sm:$0xff] }
  0x16   : > { %601 = vmatpush1.msra.mxu1 %v550_v19  ;;  %467 = vmatprep.subr.mxu0 %v411_v20  ;;  %v544_v31 = vld [vmem:[%s1935_s2 + $0x80] sm:$0xff]  ;;  %v543_v33 = vld [vmem:[%s1935_s2 + $0x78] sm:$0xff]  ;;  %v542_v35 = vld [vmem:[%s1935_s2 + $0x70] sm:$0xff] }
  0x17   : > { %602 = vmatprep.subr.mxu1 %v549_v21  ;;  %468 = vmatpush1.msra.mxu0 %v410_v22  ;;  %v403_v36 = vld [vmem:[%s1934_s1 + $0x68] sm:$0xff]  ;;  %v402_v38 = vld [vmem:[%s1934_s1 + $0x60] sm:$0xff]  ;;  %v401_v40 = vld [vmem:[%s1934_s1 + $0x58] sm:$0xff] }
  0x18   : > { %603 = vmatpush1.msra.mxu1 %v548_v23  ;;  %469 = vmatprep.subr.mxu0 %v409_v24  ;;  %v541_v37 = vld [vmem:[%s1935_s2 + $0x68] sm:$0xff]  ;;  %v540_v39 = vld [vmem:[%s1935_s2 + $0x60] sm:$0xff]  ;;  %v539_v41 = vld [vmem:[%s1935_s2 + $0x58] sm:$0xff] }
  0x19   : > { %604 = vmatprep.subr.mxu1 %v547_v25  ;;  %470 = vmatpush1.msra.mxu0 %v408_v26  ;;  %v400_v42 = vld [vmem:[%s1934_s1 + $0x50] sm:$0xff]  ;;  %v399_v44 = vld [vmem:[%s1934_s1 + $0x48] sm:$0xff]  ;;  %v398_v46 = vld [vmem:[%s1934_s1 + $0x40] sm:$0xff] }
  0x1a   : > { %605 = vmatpush1.msra.mxu1 %v546_v27  ;;  %471 = vmatprep.subr.mxu0 %v407_v28  ;;  %v538_v43 = vld [vmem:[%s1935_s2 + $0x50] sm:$0xff]  ;;  %v537_v45 = vld [vmem:[%s1935_s2 + $0x48] sm:$0xff]  ;;  %v536_v47 = vld [vmem:[%s1935_s2 + $0x40] sm:$0xff] }
  0x1b   : > { %606 = vmatprep.subr.mxu1 %v545_v29  ;;  %472 = vmatpush1.msra.mxu0 %v406_v30  ;;  %v397_v48 = vld [vmem:[%s1934_s1 + $0x38] sm:$0xff]  ;;  %v396_v50 = vld [vmem:[%s1934_s1 + $0x30] sm:$0xff]  ;;  %v395_v52 = vld [vmem:[%s1934_s1 + $0x28] sm:$0xff] }
  0x1c   : > { %607 = vmatpush1.msra.mxu1 %v544_v31  ;;  %473 = vmatprep.subr.mxu0 %v405_v32  ;;  %v535_v49 = vld [vmem:[%s1935_s2 + $0x38] sm:$0xff]  ;;  %v534_v51 = vld [vmem:[%s1935_s2 + $0x30] sm:$0xff]  ;;  %v533_v53 = vld [vmem:[%s1935_s2 + $0x28] sm:$0xff] }
  0x1d   : > { %608 = vmatprep.subr.mxu1 %v543_v33  ;;  %474 = vmatpush1.msra.mxu0 %v404_v34  ;;  %v394_v54 = vld [vmem:[%s1934_s1 + $0x20] sm:$0xff]  ;;  %v393_v56 = vld [vmem:[%s1934_s1 + $0x18] sm:$0xff]  ;;  %v392_v58 = vld [vmem:[%s1934_s1 + $0x10] sm:$0xff] }
  0x1e   : > { %609 = vmatpush1.msra.mxu1 %v542_v35  ;;  %475 = vmatprep.subr.mxu0 %v403_v36  ;;  %v532_v55 = vld [vmem:[%s1935_s2 + $0x20] sm:$0xff]  ;;  %v531_v57 = vld [vmem:[%s1935_s2 + $0x18] sm:$0xff]  ;;  %v530_v59 = vld [vmem:[%s1935_s2 + $0x10] sm:$0xff] }
  0x1f   : > { %610 = vmatprep.subr.mxu1 %v541_v37  ;;  %476 = vmatpush1.msra.mxu0 %v402_v38  ;;  %v391_v60 = vld [vmem:[%s1934_s1 + $0x8] sm:$0xff]  ;;  %v390_v62 = vld [vmem:[%s1934_s1] sm:$0xff]  ;;  %v453_v0 = vld [vmem:[%s1934_s1 + $0x1f8] sm:$0xff] }
  0x20   : > { %611 = vmatpush1.msra.mxu1 %v540_v39  ;;  %477 = vmatprep.subr.mxu0 %v401_v40  ;;  %v529_v61 = vld [vmem:[%s1935_s2 + $0x8] sm:$0xff]  ;;  %v528_v63 = vld [vmem:[%s1935_s2] sm:$0xff]  ;;  %v591_v1 = vld [vmem:[%s1935_s2 + $0x1f8] sm:$0xff] }
  0x21   : > { %612 = vmatprep.subr.mxu1 %v539_v41  ;;  %478 = vmatpush1.msra.mxu0 %v400_v42  ;;  %v452_v2 = vld [vmem:[%s1934_s1 + $0x1f0] sm:$0xff]  ;;  %v451_v4 = vld [vmem:[%s1934_s1 + $0x1e8] sm:$0xff]  ;;  %v450_v6 = vld [vmem:[%s1934_s1 + $0x1e0] sm:$0xff] }
  0x22   : > { %613 = vmatpush1.msra.mxu1 %v538_v43  ;;  %479 = vmatprep.subr.mxu0 %v399_v44  ;;  %v590_v3 = vld [vmem:[%s1935_s2 + $0x1f0] sm:$0xff]  ;;  %v589_v5 = vld [vmem:[%s1935_s2 + $0x1e8] sm:$0xff]  ;;  %v588_v7 = vld [vmem:[%s1935_s2 + $0x1e0] sm:$0xff] }
  0x23   : > { %614 = vmatprep.subr.mxu1 %v537_v45  ;;  %480 = vmatpush1.msra.mxu0 %v398_v46  ;;  %v449_v8 = vld [vmem:[%s1934_s1 + $0x1d8] sm:$0xff]  ;;  %v448_v10 = vld [vmem:[%s1934_s1 + $0x1d0] sm:$0xff]  ;;  %v447_v12 = vld [vmem:[%s1934_s1 + $0x1c8] sm:$0xff] }
  0x24   : > { %615 = vmatpush1.msra.mxu1 %v536_v47  ;;  %481 = vmatprep.subr.mxu0 %v397_v48  ;;  %v587_v9 = vld [vmem:[%s1935_s2 + $0x1d8] sm:$0xff]  ;;  %v586_v11 = vld [vmem:[%s1935_s2 + $0x1d0] sm:$0xff]  ;;  %v585_v13 = vld [vmem:[%s1935_s2 + $0x1c8] sm:$0xff] }
  0x25   : > { %616 = vmatprep.subr.mxu1 %v535_v49  ;;  %482 = vmatpush1.msra.mxu0 %v396_v50  ;;  %v446_v14 = vld [vmem:[%s1934_s1 + $0x1c0] sm:$0xff]  ;;  %v445_v16 = vld [vmem:[%s1934_s1 + $0x1b8] sm:$0xff]  ;;  %v444_v18 = vld [vmem:[%s1934_s1 + $0x1b0] sm:$0xff] }
  0x26   : > { %617 = vmatpush1.msra.mxu1 %v534_v51  ;;  %483 = vmatprep.subr.mxu0 %v395_v52  ;;  %v584_v15 = vld [vmem:[%s1935_s2 + $0x1c0] sm:$0xff]  ;;  %v583_v17 = vld [vmem:[%s1935_s2 + $0x1b8] sm:$0xff]  ;;  %v582_v19 = vld [vmem:[%s1935_s2 + $0x1b0] sm:$0xff] }
  0x27   : > { %618 = vmatprep.subr.mxu1 %v533_v53  ;;  %484 = vmatpush1.msra.mxu0 %v394_v54  ;;  %v443_v20 = vld [vmem:[%s1934_s1 + $0x1a8] sm:$0xff]  ;;  %v442_v22 = vld [vmem:[%s1934_s1 + $0x1a0] sm:$0xff]  ;;  %v441_v24 = vld [vmem:[%s1934_s1 + $0x198] sm:$0xff] }
  0x28   : > { %619 = vmatpush1.msra.mxu1 %v532_v55  ;;  %485 = vmatprep.subr.mxu0 %v393_v56  ;;  %v581_v21 = vld [vmem:[%s1935_s2 + $0x1a8] sm:$0xff]  ;;  %v580_v23 = vld [vmem:[%s1935_s2 + $0x1a0] sm:$0xff]  ;;  %v579_v25 = vld [vmem:[%s1935_s2 + $0x198] sm:$0xff] }
  0x29   : > { %620 = vmatprep.subr.mxu1 %v531_v57  ;;  %486 = vmatpush1.msra.mxu0 %v392_v58  ;;  %v440_v26 = vld [vmem:[%s1934_s1 + $0x190] sm:$0xff]  ;;  %v439_v28 = vld [vmem:[%s1934_s1 + $0x188] sm:$0xff]  ;;  %v438_v30 = vld [vmem:[%s1934_s1 + $0x180] sm:$0xff] }
  0x2a   : > { %621 = vmatpush1.msra.mxu1 %v530_v59  ;;  %487 = vmatprep.subr.mxu0 %v391_v60  ;;  %v578_v27 = vld [vmem:[%s1935_s2 + $0x190] sm:$0xff]  ;;  %v577_v29 = vld [vmem:[%s1935_s2 + $0x188] sm:$0xff]  ;;  %v576_v31 = vld [vmem:[%s1935_s2 + $0x180] sm:$0xff] }
  0x2b   : > { %622 = vmatprep.subr.mxu1 %v529_v61  ;;  %488 = vmatpush1.msra.mxu0 %v390_v62  ;;  %v437_v32 = vld [vmem:[%s1934_s1 + $0x178] sm:$0xff]  ;;  %v436_v34 = vld [vmem:[%s1934_s1 + $0x170] sm:$0xff]  ;;  %v435_v36 = vld [vmem:[%s1934_s1 + $0x168] sm:$0xff] }
  0x2c   : > { %623 = vmatpush1.msra.mxu1 %v528_v63  ;;  %489 = vmatprep.subr.mxu0 %v453_v0  ;;  %v575_v33 = vld [vmem:[%s1935_s2 + $0x178] sm:$0xff]  ;;  %v574_v35 = vld [vmem:[%s1935_s2 + $0x170] sm:$0xff]  ;;  %v573_v37 = vld [vmem:[%s1935_s2 + $0x168] sm:$0xff] }
  0x2d   : > { %624 = vmatprep.subr.mxu1 %v591_v1  ;;  %490 = vmatpush2.msra.mxu0 %v452_v2  ;;  %v434_v38 = vld [vmem:[%s1934_s1 + $0x160] sm:$0xff]  ;;  %v433_v40 = vld [vmem:[%s1934_s1 + $0x158] sm:$0xff]  ;;  %v432_v42 = vld [vmem:[%s1934_s1 + $0x150] sm:$0xff] }
  0x2e   : > { %625 = vmatpush2.msra.mxu1 %v590_v3  ;;  %491 = vmatprep.subr.mxu0 %v451_v4  ;;  %v572_v39 = vld [vmem:[%s1935_s2 + $0x160] sm:$0xff]  ;;  %v571_v41 = vld [vmem:[%s1935_s2 + $0x158] sm:$0xff]  ;;  %v570_v43 = vld [vmem:[%s1935_s2 + $0x150] sm:$0xff]  ;;  %v1214_v3 = vmov 0  }
  0x2f   : > { %626 = vmatprep.subr.mxu1 %v589_v5  ;;  %492 = vmatpush2.msra.mxu0 %v450_v6  ;;  %v431_v44 = vld [vmem:[%s1934_s1 + $0x148] sm:$0xff]  ;;  %v430_v46 = vld [vmem:[%s1934_s1 + $0x140] sm:$0xff]  ;;  %v429_v49 = vld [vmem:[%s1934_s1 + $0x138] sm:$0xff] }
  0x30   : > { %627 = vmatpush2.msra.mxu1 %v588_v7  ;;  %493 = vmatprep.subr.mxu0 %v449_v8  ;;  %v569_v45 = vld [vmem:[%s1935_s2 + $0x148] sm:$0xff]  ;;  %v568_v47 = vld [vmem:[%s1935_s2 + $0x140] sm:$0xff]  ;;  %v567_v50 = vld [vmem:[%s1935_s2 + $0x138] sm:$0xff] }
  0x31   : > { %628 = vmatprep.subr.mxu1 %v587_v9  ;;  %494 = vmatpush2.msra.mxu0 %v448_v10  ;;  %v388_v48 = vld [vmem:[%s381_s12] sm:$0xf]  ;;  %v428_v51 = vld [vmem:[%s1934_s1 + $0x130] sm:$0xff]  ;;  %v427_v53 = vld [vmem:[%s1934_s1 + $0x128] sm:$0xff] }
  0x32   : > { %629 = vmatpush2.msra.mxu1 %v586_v11  ;;  %495 = vmatprep.subr.mxu0 %v447_v12  ;;  %v566_v52 = vld [vmem:[%s1935_s2 + $0x130] sm:$0xff]  ;;  %v565_v54 = vld [vmem:[%s1935_s2 + $0x128] sm:$0xff]  ;;  %v389_v55 = vunpack.c.l.bf16 %v388_v48  ;;  %v426_v56 = vld [vmem:[%s1934_s1 + $0x120] sm:$0xff] }
  0x33   : > { %630 = vmatprep.subr.mxu1 %v585_v13  ;;  %496 = vmatpush2.msra.mxu0 %v446_v14  ;;  %v564_v57 = vld [vmem:[%s1935_s2 + $0x120] sm:$0xff]  ;;  %v425_v58 = vld [vmem:[%s1934_s1 + $0x118] sm:$0xff]  ;;  %v424_v60 = vld [vmem:[%s1934_s1 + $0x110] sm:$0xff] }
  0x34   : > { %631 = vmatpush2.msra.mxu1 %v584_v15  ;;  %497 = vmatprep.subr.mxu0 %v445_v16  ;;  %v563_v59 = vld [vmem:[%s1935_s2 + $0x118] sm:$0xff]  ;;  %v562_v61 = vld [vmem:[%s1935_s2 + $0x110] sm:$0xff]  ;;  %v423_v62 = vld [vmem:[%s1934_s1 + $0x108] sm:$0xff]  ;;  %v455_v0 = vcombine.high %v389_v55, %v389_v55 }
  0x35   : > { %632 = vmatprep.subr.mxu1 %v583_v17  ;;  %498 = vmatpush2.msra.mxu0 %v444_v18  ;;  %v561_v63 = vld [vmem:[%s1935_s2 + $0x108] sm:$0xff]  ;;  %v422_v1 = vld [vmem:[%s1934_s1 + $0x100] sm:$0xff]  ;;  %v912_v18 = vld [vmem:[%s1942_s9 + $0xf8] sm:$0xff] }
  0x36   : > { %633 = vmatpush2.msra.mxu1 %v582_v19  ;;  %499 = vmatprep.subr.mxu0 %v443_v20  ;;  %v560_v2 = vld [vmem:[%s1935_s2 + $0x100] sm:$0xff]  ;;  %v948_v19 = vld [vmem:[%s1943_s10 + $0xf8] sm:$0xff]  ;;  %v898_v48 = vld [vmem:[%s1942_s9 + $0x88] sm:$0xff] }
  0x37   : > { %634 = vmatprep.subr.mxu1 %v581_v21  ;;  %500 = vmatpush2.msra.mxu0 %v442_v22  ;;  %v771_v4 = vld [vmem:[%s1940_s7] sm:$0xf]  ;;  %v911_v22 = vld [vmem:[%s1942_s9 + $0xf0] sm:$0xff] }
  0x38   : > { %635 = vmatpush2.msra.mxu1 %v580_v23  ;;  %501 = vmatprep.subr.mxu0 %v441_v24  ;;  %v869_v5 = vld [vmem:[%s1941_s8] sm:$0xf]  ;;  %v947_v23 = vld [vmem:[%s1943_s10 + $0xf0] sm:$0xff]  ;;  %v910_v24 = vld [vmem:[%s1942_s9 + $0xe8] sm:$0xff] }
  0x39   : > { %636 = vmatprep.subr.mxu1 %v579_v25  ;;  %502 = vmatpush2.msra.mxu0 %v440_v26  ;;  %v668_v16 = vld [vmem:[%s1937_s4] sm:$0x3]  ;;  %v946_v25 = vld [vmem:[%s1943_s10 + $0xe8] sm:$0xff] }
  0x3a   : > { %637 = vmatpush2.msra.mxu1 %v578_v27  ;;  %503 = vmatprep.subr.mxu0 %v439_v28  ;;  %v667_v17 = vld [vmem:[%s1936_s3] sm:$0x3]  ;;  %v908_v28 = vld [vmem:[%s1942_s9 + $0xd8] sm:$0xff] }
  0x3b   : > { %638 = vmatprep.subr.mxu1 %v577_v29  ;;  %504 = vmatpush2.msra.mxu0 %v438_v30  ;;  %v780_v20 = vld [vmem:[%s1939_s6] sm:$0x3]  ;;  %v944_v29 = vld [vmem:[%s1943_s10 + $0xd8] sm:$0xff]  ;;  %v907_v30 = vld [vmem:[%s1942_s9 + $0xd0] sm:$0xff] }
  0x3c   : > { %639 = vmatpush2.msra.mxu1 %v576_v31  ;;  %505 = vmatprep.subr.mxu0 %v437_v32  ;;  %v779_v21 = vld [vmem:[%s1938_s5] sm:$0x3]  ;;  %v943_v31 = vld [vmem:[%s1943_s10 + $0xd0] sm:$0xff]  ;;  %v906_v32 = vld [vmem:[%s1942_s9 + $0xc8] sm:$0xff] }
  0x3d   : > { %640 = vmatprep.subr.mxu1 %v575_v33  ;;  %506 = vmatpush2.msra.mxu0 %v436_v34  ;;  %v909_v26 = vld [vmem:[%s1942_s9 + $0xe0] sm:$0xff]  ;;  %v942_v33 = vld [vmem:[%s1943_s10 + $0xc8] sm:$0xff] }
  0x3e   : > { %641 = vmatpush2.msra.mxu1 %v574_v35  ;;  %507 = vmatprep.subr.mxu0 %v435_v36  ;;  %v945_v27 = vld [vmem:[%s1943_s10 + $0xe0] sm:$0xff]  ;;  %v904_v36 = vld [vmem:[%s1942_s9 + $0xb8] sm:$0xff] }
  0x3f   : > { %642 = vmatprep.subr.mxu1 %v573_v37  ;;  %508 = vmatpush2.msra.mxu0 %v434_v38  ;;  %v905_v34 = vld [vmem:[%s1942_s9 + $0xc0] sm:$0xff]  ;;  %v940_v37 = vld [vmem:[%s1943_s10 + $0xb8] sm:$0xff]  ;;  %v903_v38 = vld [vmem:[%s1942_s9 + $0xb0] sm:$0xff] }
  0x40   : > { %643 = vmatpush2.msra.mxu1 %v572_v39  ;;  %509 = vmatprep.subr.mxu0 %v433_v40  ;;  %v941_v35 = vld [vmem:[%s1943_s10 + $0xc0] sm:$0xff]  ;;  %v939_v39 = vld [vmem:[%s1943_s10 + $0xb0] sm:$0xff]  ;;  %v902_v40 = vld [vmem:[%s1942_s9 + $0xa8] sm:$0xff] }
  0x41   : > { %644 = vmatprep.subr.mxu1 %v571_v41  ;;  %510 = vmatpush2.msra.mxu0 %v432_v42  ;;  %v938_v41 = vld [vmem:[%s1943_s10 + $0xa8] sm:$0xff]  ;;  %v901_v42 = vld [vmem:[%s1942_s9 + $0xa0] sm:$0xff] }
  0x42   : > { %645 = vmatpush2.msra.mxu1 %v570_v43  ;;  %511 = vmatprep.subr.mxu0 %v431_v44  ;;  %v937_v43 = vld [vmem:[%s1943_s10 + $0xa0] sm:$0xff]  ;;  %v900_v44 = vld [vmem:[%s1942_s9 + $0x98] sm:$0xff] }
  0x43   : > { %646 = vmatprep.subr.mxu1 %v569_v45  ;;  %512 = vmatpush2.msra.mxu0 %v430_v46  ;;  %v936_v45 = vld [vmem:[%s1943_s10 + $0x98] sm:$0xff]  ;;  %v899_v46 = vld [vmem:[%s1942_s9 + $0x90] sm:$0xff] }
  0x44   : > { %647 = vmatpush2.msra.mxu1 %v568_v47  ;;  %513 = vmatprep.subr.mxu0 %v429_v49  ;;  %v935_v47 = vld [vmem:[%s1943_s10 + $0x90] sm:$0xff]  ;;  %v934_v49 = vld [vmem:[%s1943_s10 + $0x88] sm:$0xff] }
  0x45   : > { %648 = vmatprep.subr.mxu1 %v567_v50  ;;  %514 = vmatpush2.msra.mxu0 %v428_v51  ;;  %v897_v50 = vld [vmem:[%s1942_s9 + $0x80] sm:$0xff] }
  0x46   : > { %649 = vmatpush2.msra.mxu1 %v566_v52  ;;  %515 = vmatprep.subr.mxu0 %v427_v53  ;;  %v933_v51 = vld [vmem:[%s1943_s10 + $0x80] sm:$0xff]  ;;  %v896_v52 = vld [vmem:[%s1942_s9 + $0x78] sm:$0xff] }
  0x47   : > { %650 = vmatprep.subr.mxu1 %v565_v54  ;;  %516 = vmatpush2.msra.mxu0 %v426_v56  ;;  %v932_v53 = vld [vmem:[%s1943_s10 + $0x78] sm:$0xff]  ;;  %v895_v54 = vld [vmem:[%s1942_s9 + $0x70] sm:$0xff]  ;;  %v894_v56 = vld [vmem:[%s1942_s9 + $0x68] sm:$0xff] }
  0x48   : > { %651 = vmatpush2.msra.mxu1 %v564_v57  ;;  %517 = vmatprep.subr.mxu0 %v425_v58  ;;  %v893_v57 = vld [vmem:[%s1942_s9 + $0x60] sm:$0xff]  ;;  %v892_v58 = vld [vmem:[%s1942_s9 + $0x58] sm:$0xff] }
  0x49   : > { %652 = vmatprep.subr.mxu1 %v563_v59  ;;  %518 = vmatpush2.msra.mxu0 %v424_v60  ;;  %v891_v59 = vld [vmem:[%s1942_s9 + $0x50] sm:$0xff]  ;;  %v890_v60 = vld [vmem:[%s1942_s9 + $0x48] sm:$0xff] }
  0x4a   : > { %653 = vmatpush2.msra.mxu1 %v562_v61  ;;  %519 = vmatprep.subr.mxu0 %v423_v62  ;;  %v889_v61 = vld [vmem:[%s1942_s9 + $0x40] sm:$0xff]  ;;  %v888_v62 = vld [vmem:[%s1942_s9 + $0x38] sm:$0xff] }
  0x4b   : > { %654 = vmatprep.subr.mxu1 %v561_v63  ;;  %520 = vmatpush2.msra.mxu0 %v422_v1  ;;  %v887_v63 = vld [vmem:[%s1942_s9 + $0x30] sm:$0xff]  ;;  %v886_v1 = vld [vmem:[%s1942_s9 + $0x28] sm:$0xff] }
  0x4c   : > { %521 = vmatprep.mubr.f32.mxu0 %v455_v0  ;;  %655 = vmatpush2.msra.mxu1 %v560_v2  ;;  %v929_v2 = vld [vmem:[%s1943_s10 + $0x60] sm:$0xff] }
  0x4d   : > { %656 = vmatprep.mubr.f32.mxu1 %v455_v0  ;;  %522 = vmatmul.mubr.f32.vlgmr.msra.gmra.mxu0 %v389_v55  ;;  %v930_v0 = vld [vmem:[%s1943_s10 + $0x68] sm:$0xff] }
  0x4e   : > { %657 = vmatmul.mubr.f32.vlgmr.msra.gmra.mxu1 %v389_v55  ;;  %712 = vmatprep.mubr.bf16.mxu0 %v1214_v3  ;;  %v931_v55 = vld [vmem:[%s1943_s10 + $0x70] sm:$0xff] }
  0x4f   : > { %762 = vmatprep.mubr.bf16.mxu1 %v1214_v3  ;;  %1205 = vset.pattern.permute.xlu0 %v1214_v3 }
  0x50   : > { %774 = vperm.xlu0 %1205, %v771_v4   ;;  %v928_v4 = vld [vmem:[%s1943_s10 + $0x58] sm:$0xff] }
  0x54   : > { %872 = vperm.xlu0 %1205, %v869_v5   ;;  %v884_v5 = vld [vmem:[%s1942_s9 + $0x18] sm:$0xff] }
 0x10d   : > { %v523_v6 = vpop.f32.mrf.mxu0 }
 0x10e   : > { %v658_v7 = vpop.f32.mrf.mxu1  ;;  %v663_v8 = vpack.c.bf16 %v523_v6, %v523_v6  ;;  %v927_v6 = vld [vmem:[%s1943_s10 + $0x50] sm:$0xff] }
 0x10f   : > { %v665_v9 = vpack.c.bf16 %v658_v7, %v658_v7  ;;  %v525_v10 = vpop.f32.mrf.mxu0  ;;  %v883_v7 = vld [vmem:[%s1942_s9 + $0x10] sm:$0xff] }
 0x110   : > { %v660_v11 = vpop.f32.mrf.mxu1  ;;  %v664_v12 = vpack.c.bf16 %v525_v10, %v525_v10  ;;  %v725_v14 = vsel %vm673_vm0, %v663_v8, 0  ;;  %v926_v8 = vld [vmem:[%s1943_s10 + $0x48] sm:$0xff]  ;;  %v925_v10 = vld [vmem:[%s1943_s10 + $0x40] sm:$0xff] }
 0x111   : > { %v666_v13 = vpack.c.bf16 %v660_v11, %v660_v11  ;;  %v675_v15 = vsel %vm673_vm0, %v665_v9, 0  ;;  %v882_v9 = vld [vmem:[%s1942_s9 + $0x8] sm:$0xff]  ;;  %v881_v11 = vld [vmem:[%s1942_s9] sm:$0xff] }
 0x112   : > { %1182 = vmatprep.subr.msk.bf16.mxu1 %vm673_vm0, %v664_v12 }
 0x113   : > { %1180 = vmatprep.subr.msk.bf16.mxu0 %vm673_vm0, %v666_v13  ;;  %745 = vmatpush1.bf16.msra.mxu1 %v725_v14 }
 0x114   : > { %695 = vmatpush1.bf16.msra.mxu0 %v675_v15  ;;  %1186 = vmatprep.subr.msk.bf16.mxu1 %vm673_vm0, %v664_v12  ;;  %v924_v12 = vld [vmem:[%s1943_s10 + $0x38] sm:$0xff] }
 0x115   : > { %1184 = vmatprep.subr.msk.bf16.mxu0 %vm673_vm0, %v666_v13  ;;  %v916_v13 = vld [vmem:[%s1942_s9 + $0x118] sm:$0xff] }
 0x116   : > { %1183 = vmatmul.mubr.msk.bf16.vlgmr.msra.gmra.mxu1 %vm669_vm1, %v667_v17  ;;  %v914_v17 = vld [vmem:[%s1942_s9 + $0x108] sm:$0xff] }
 0x117   : > { %1181 = vmatmul.mubr.msk.bf16.vlgmr.msra.gmra.mxu0 %vm669_vm1, %v668_v16  ;;  %843 = vmatpush1.bf16.msra.mxu1 %v725_v14  ;;  %v923_v14 = vld [vmem:[%s1943_s10 + $0x30] sm:$0xff]  ;;  %v922_v16 = vld [vmem:[%s1943_s10 + $0x28] sm:$0xff] }
 0x118   : > { %799 = vmatpush1.bf16.msra.mxu0 %v675_v15  ;;  %816 = vmatprep.mubr.bf16.mxu0 %v1214_v3  ;;  %v915_v15 = vld [vmem:[%s1942_s9 + $0x110] sm:$0xff] }
 0x119   : > { %860 = vmatprep.mubr.bf16.mxu1 %v1214_v3  ;;  %1031 = vmatprep.subr.mxu1 %v912_v18  ;;  %v885_v3 = vld [vmem:[%s1942_s9 + $0x20] sm:$0xff] }
 0x11a   : > { %957 = vmatprep.subr.mxu0 %v948_v19  ;;  %v921_v18 = vld [vmem:[%s1943_s10 + $0x20] sm:$0xff] }
 0x11b   : > { %v913_v19 = vld [vmem:[%s1942_s9 + $0x100] sm:$0xff] }
 0x11e   : > { %1187 = vmatmul.mubr.msk.bf16.vlgmr.msra.gmra.mxu1 %vm669_vm1, %v779_v21  ;;  %v919_v21 = vld [vmem:[%s1943_s10 + $0x10] sm:$0xff] }
 0x11f   : > { %1185 = vmatmul.mubr.msk.bf16.vlgmr.msra.gmra.mxu0 %vm669_vm1, %v780_v20  ;;  %1032 = vmatpush1.msra.mxu1 %v911_v22  ;;  %v920_v20 = vld [vmem:[%s1943_s10 + $0x18] sm:$0xff]  ;;  %v918_v22 = vld [vmem:[%s1943_s10 + $0x8] sm:$0xff] }
 0x120   : > { %958 = vmatpush1.msra.mxu0 %v947_v23  ;;  %1033 = vmatprep.subr.mxu1 %v910_v24  ;;  %v917_v23 = vld [vmem:[%s1943_s10] sm:$0xff]  ;;  %v952_v24 = vld [vmem:[%s1943_s10 + $0x118] sm:$0xff] }
 0x121   : > { %959 = vmatprep.subr.mxu0 %v946_v25  ;;  %1034 = vmatpush1.msra.mxu1 %v909_v26  ;;  %v951_v25 = vld [vmem:[%s1943_s10 + $0x110] sm:$0xff]  ;;  %v950_v26 = vld [vmem:[%s1943_s10 + $0x108] sm:$0xff] }
 0x122   : > { %960 = vmatpush1.msra.mxu0 %v945_v27  ;;  %1035 = vmatprep.subr.mxu1 %v908_v28  ;;  %v949_v27 = vld [vmem:[%s1943_s10 + $0x100] sm:$0xff] }
 0x123   : > { %961 = vmatprep.subr.mxu0 %v944_v29  ;;  %1036 = vmatpush1.msra.mxu1 %v907_v30 }
 0x124   : > { %962 = vmatpush1.msra.mxu0 %v943_v31  ;;  %1037 = vmatprep.subr.mxu1 %v906_v32  ;;  %v775_v31 = vpop.permute.xlu0 %774 }
 0x125   : > { %963 = vmatprep.subr.mxu0 %v942_v33  ;;  %1038 = vmatpush1.msra.mxu1 %v905_v34 }
 0x126   : > { %964 = vmatpush1.msra.mxu0 %v941_v35  ;;  %1039 = vmatprep.subr.mxu1 %v904_v36 }
 0x127   : > { %965 = vmatprep.subr.mxu0 %v940_v37  ;;  %1040 = vmatpush1.msra.mxu1 %v903_v38 }
 0x128   : > { %966 = vmatpush1.msra.mxu0 %v939_v39  ;;  %1041 = vmatprep.subr.mxu1 %v902_v40 }
 0x129   : > { %967 = vmatprep.subr.mxu0 %v938_v41  ;;  %1042 = vmatpush1.msra.mxu1 %v901_v42 }
 0x12a   : > { %968 = vmatpush1.msra.mxu0 %v937_v43  ;;  %1043 = vmatprep.subr.mxu1 %v900_v44 }
 0x12b   : > { %969 = vmatprep.subr.mxu0 %v936_v45  ;;  %1044 = vmatpush1.msra.mxu1 %v899_v46 }
 0x12c   : > { %970 = vmatpush1.msra.mxu0 %v935_v47  ;;  %1045 = vmatprep.subr.mxu1 %v898_v48  ;;  %v873_v48 = vpop.permute.xlu0 %872 }
 0x12d   : > { %971 = vmatprep.subr.mxu0 %v934_v49  ;;  %1046 = vmatpush1.msra.mxu1 %v897_v50 }
 0x12e   : > { %972 = vmatpush1.msra.mxu0 %v933_v51  ;;  %1047 = vmatprep.subr.mxu1 %v896_v52 }
 0x12f   : > { %973 = vmatprep.subr.mxu0 %v932_v53  ;;  %1048 = vmatpush1.msra.mxu1 %v895_v54 }
 0x130   : > { %974 = vmatpush1.msra.mxu0 %v931_v55  ;;  %1049 = vmatprep.subr.mxu1 %v894_v56 }
 0x131   : > { %1050 = vmatpush1.msra.mxu1 %v893_v57  ;;  %975 = vmatprep.subr.mxu0 %v930_v0 }
 0x132   : > { %1051 = vmatprep.subr.mxu1 %v892_v58  ;;  %976 = vmatpush1.msra.mxu0 %v929_v2 }
 0x133   : > { %1052 = vmatpush1.msra.mxu1 %v891_v59  ;;  %977 = vmatprep.subr.mxu0 %v928_v4 }
 0x134   : > { %1053 = vmatprep.subr.mxu1 %v890_v60  ;;  %978 = vmatpush1.msra.mxu0 %v927_v6 }
 0x135   : > { %1054 = vmatpush1.msra.mxu1 %v889_v61  ;;  %979 = vmatprep.subr.mxu0 %v926_v8 }
 0x136   : > { %1055 = vmatprep.subr.mxu1 %v888_v62  ;;  %980 = vmatpush1.msra.mxu0 %v925_v10 }
 0x137   : > { %1056 = vmatpush1.msra.mxu1 %v887_v63  ;;  %981 = vmatprep.subr.mxu0 %v924_v12 }
 0x138   : > { %1057 = vmatprep.subr.mxu1 %v886_v1  ;;  %982 = vmatpush1.msra.mxu0 %v923_v14 }
 0x139   : > { %1058 = vmatpush1.msra.mxu1 %v885_v3  ;;  %983 = vmatprep.subr.mxu0 %v922_v16 }
 0x13a   : > { %1059 = vmatprep.subr.mxu1 %v884_v5  ;;  %984 = vmatpush1.msra.mxu0 %v921_v18 }
 0x13b   : > { %1060 = vmatpush1.msra.mxu1 %v883_v7  ;;  %985 = vmatprep.subr.mxu0 %v920_v20 }
 0x13c   : > { %1061 = vmatprep.subr.mxu1 %v882_v9  ;;  %986 = vmatpush1.msra.mxu0 %v919_v21 }
 0x13d   : > { %1062 = vmatpush1.msra.mxu1 %v881_v11  ;;  %987 = vmatprep.subr.mxu0 %v918_v22 }
 0x13e   : > { %1091 = vmatprep.subr.mxu1 %v916_v13  ;;  %988 = vmatpush1.msra.mxu0 %v917_v23 }
 0x13f   : > { %1092 = vmatpush2.msra.mxu1 %v915_v15  ;;  %1017 = vmatprep.subr.mxu0 %v952_v24 }
 0x140   : > { %1093 = vmatprep.subr.mxu1 %v914_v17  ;;  %1018 = vmatpush2.msra.mxu0 %v951_v25 }
 0x141   : > { %1094 = vmatpush2.msra.mxu1 %v913_v19  ;;  %1019 = vmatprep.subr.mxu0 %v950_v26 }
 0x142   : > { %1020 = vmatpush2.msra.mxu0 %v949_v27 }
 0x1d6   : > { %v764_v29 = vpop.f32.mrf.mxu1 }
 0x1d7   : > { %v714_v28 = vpop.f32.mrf.mxu0 }
 0x1d8   : > { %v765_v30 = vadd.f32 %v764_v29, %v714_v28  ;;  %v766_v33 = vpop.f32.mrf.mxu1 }
 0x1d9   : > { %v716_v32 = vpop.f32.mrf.mxu0 }
 0x1da   : > { %v767_v34 = vadd.f32 %v766_v33, %v716_v32  ;;  %v777_v35 = vadd.f32 %v775_v31, %v765_v30  ;;  %v768_v37 = vpop.f32.mrf.mxu1 }
 0x1db   : > { %v718_v36 = vpop.f32.mrf.mxu0 }
 0x1dc   : > { %v778_v38 = vadd.f32 %v775_v31, %v767_v34  ;;  %v769_v40 = vpop.f32.mrf.mxu1  ;;  %v877_v42 = vmax.f32 %v777_v35, 0.0 }
 0x1dd   : > { %v719_v39 = vpop.f32.mrf.mxu0 }
 0x1de   : > { %v878_v41 = vmax.f32 %v778_v38, 0.0  ;;  %v862_v44 = vpop.f32.mrf.mxu1 }
 0x1df   : > { %v818_v43 = vpop.f32.mrf.mxu0 }
 0x1e0   : > { %v863_v45 = vadd.f32 %v862_v44, %v818_v43  ;;  %1189 = vmatprep.mubr.msk.f32.mxu1 %vm953_vm2, %v878_v41  ;;  %v864_v47 = vpop.f32.mrf.mxu1 }
 0x1e1   : > { %v820_v46 = vpop.f32.mrf.mxu0  ;;  %1096 = vmatmul.mubr.f32.vlgmr.msra.gmra.mxu1 %v877_v42 }
 0x1e2   : > { %v865_v49 = vadd.f32 %v864_v47, %v820_v46  ;;  %v875_v50 = vadd.f32 %v873_v48, %v863_v45  ;;  %v866_v52 = vpop.f32.mrf.mxu1 }
 0x1e3   : > { %v822_v51 = vpop.f32.mrf.mxu0 }
 0x1e4   : > { %v876_v53 = vadd.f32 %v873_v48, %v865_v49  ;;  %v867_v55 = vpop.f32.mrf.mxu1  ;;  %v879_v57 = vmax.f32 %v875_v50, 0.0 }
 0x1e5   : > { %v823_v54 = vpop.f32.mrf.mxu0 }
 0x1e6   : > { %v880_v56 = vmax.f32 %v876_v53, 0.0 }
 0x1e8   : > { %1188 = vmatprep.mubr.msk.f32.mxu0 %vm953_vm2, %v880_v56 }
 0x1e9   : > { %1022 = vmatmul.mubr.f32.vlgmr.msra.gmra.mxu0 %v879_v57 }
 0x2a1   : > { %v1097_v58 = vpop.f32.mrf.mxu1 }
 0x2a3   : > { %v1099_v60 = vpop.f32.mrf.mxu1 }
 0x2a9   : > { %v1023_v59 = vpop.f32.mrf.mxu0 }
 0x2aa   : > { %v1098_v62 = vadd.f32 %v1097_v58, %v1023_v59 }
 0x2ab   : > { %v1025_v61 = vpop.f32.mrf.mxu0 }
 0x2ac   : > { %v1100_v63 = vadd.f32 %v1099_v60, %v1025_v61 }
 0x2ae   : > { %v1190_v0 = vpack.c.bf16 %v1100_v63, %v1098_v62 }
 0x2b0   : > { %1191 = vst.sshfl [vmem:[%s386_s26] sm:$0x33 pattern:$0x76325410] %v1190_v0 }
 0x2b1 PF: > { %s21_s17 = sadd.s32 1, %s1212_s17  }
 0x2b2   : > { %p18_p4 = scmp.ge.s32.totalorder %s21_s17, 4  }
 0x2b4   :  { %20 = sbr.rel (!%p18_p4) target bundleno = 1 (0x1), region = 94 }

// kernel: spectral_transform.6
= control target key start
LH: loop header
LB: loop body
LE: loop exit
PB: predicated region body
PF: predicated region fallthrough
CT: control target
= control target key end

     0   :  { %s1179_s17 = smov 0   ;;  %s1366_s0 = inlined_call_operand.vmem [shape: bf16[2,4,64], index: 0, kind: input, shape index: {}]   ;;  %s1367_s1 = inlined_call_operand.vmem [shape: f32[64,40], index: 1, kind: input, shape index: {}]   ;;  %s1368_s2 = inlined_call_operand.vmem [shape: f32[64,40], index: 2, kind: input, shape index: {}]   ;;  %s1369_s3 = inlined_call_operand.vmem [shape: bf16[4,4], index: 3, kind: input, shape index: {}]   ;;  %s1370_s4 = inlined_call_operand.vmem [shape: bf16[4,4], index: 4, kind: input, shape index: {}]   ;;  %s1371_s5 = inlined_call_operand.vmem [shape: bf16[4,4], index: 5, kind: input, shape index: {}]   ;;  %s1372_s6 = inlined_call_operand.vmem [shape: bf16[4,4], index: 6, kind: input, shape index: {}]   ;;  %s1373_s7 = inlined_call_operand.vmem [shape: f32[4,1], index: 7, kind: input, shape index: {}]   ;;  %s1374_s8 = inlined_call_operand.vmem [shape: f32[4,1], index: 8, kind: input, shape index: {}]   ;;  %s1375_s9 = inlined_call_operand.vmem [shape: f32[40,256], index: 9, kind: input, shape index: {}]   ;;  %s1376_s10 = inlined_call_operand.vmem [shape: f32[40,256], index: 10, kind: input, shape index: {}]   ;;  %s1377_s11 = inlined_call_operand.vmem [shape: bf16[2,4,256], index: 11, kind: output, shape index: {}]  }
   0x1 LB: > { %s987_s18 = sadd.s32 4294967295, %s1114_s17   ;;  %p991_p0 = scmp.ge.s32.totalorder %s1114_s17, 1  ;;  %s1114_s17 = sphi %s1179_s17, %s21_s17  }
   0x2   : > { %p336_p1 = scmp.lt.s32.totalorder %s1114_s17, 3 }
   0x4   : > { %p337_p2 = pnand %p991_p0, %p336_p1 }
   0x5   : > { %p375_p3 = scmp.lt.s32.totalorder (!%p337_p2), %s987_s18, 1 }
   0x6   : > { %340 = sbr.rel (%p337_p2) target bundleno = 635 (0x27b), region = 64 }
   0xb   : > { %v394_v0 = vld [vmem:[%s1367_s1 + $0x38] sm:$0xff]  ;;  %v1116_v2 = vmov 0.0   ;;  %v393_v3 = vld [vmem:[%s1367_s1 + $0x30] sm:$0xff]  ;;  %s1379_s18 = smov (!%p375_p3, %s987_s18), 1  ;;  %v392_v5 = vld [vmem:[%s1367_s1 + $0x28] sm:$0xff]  ;;  %vm395_vm0 = vcmask 523264  }
   0xc   : > { %v476_v1 = vld [vmem:[%s1368_s2 + $0x38] sm:$0xff]  ;;  %1034 = vmatprep.subr.mxu0 %v1116_v2  ;;  %1053 = vmatprep.subr.mxu1 %v1116_v2  ;;  %v475_v4 = vld [vmem:[%s1368_s2 + $0x30] sm:$0xff]  ;;  %v474_v6 = vld [vmem:[%s1368_s2 + $0x28] sm:$0xff]  ;;  %s992_s16 = sshll.u32 %s1379_s18, 1  ;;  %vm1117_vm1 = vmmov 0   ;;  %v1118_v20 = vmov 0  }
   0xd   : > { %1035 = vmatpush3.msra.mxu0 %v394_v0  ;;  %1054 = vmatpush3.msra.mxu1 %v476_v1  ;;  %v391_v7 = vld [vmem:[%s1367_s1 + $0x20] sm:$0xff]  ;;  %v390_v9 = vld [vmem:[%s1367_s1 + $0x18] sm:$0xff]  ;;  %s378_s25 = scalar_lea.vmem %s1366_s0, %s992_s16  ;;  %v389_v11 = vld [vmem:[%s1367_s1 + $0x10] sm:$0xff]  ;;  %vm555_vm2 = vcmask 1041408   ;;  %vm551_vm3 = vcmask 31744   ;;  %vm769_vm4 = vcmask 326656  }
   0xe   : > { %1036 = vmatprep.subr.mxu0 %v1116_v2  ;;  %1055 = vmatprep.subr.mxu1 %v1116_v2  ;;  %v473_v8 = vld [vmem:[%s1368_s2 + $0x20] sm:$0xff]  ;;  %v472_v10 = vld [vmem:[%s1368_s2 + $0x18] sm:$0xff]  ;;  %v471_v12 = vld [vmem:[%s1368_s2 + $0x10] sm:$0xff]  ;;  %s1007_s22 = sshll.u32 %s1379_s18, 2 }
   0xf   : > { %1037 = vmatpush3.msra.mxu0 %v393_v3  ;;  %1056 = vmatpush3.msra.mxu1 %v475_v4  ;;  %v388_v13 = vld [vmem:[%s1367_s1 + $0x8] sm:$0xff]  ;;  %v385_v15 = vld [vmem:[%s378_s25] sm:$0x3]  ;;  %v756_v36 = vld [vmem:[%s1375_s9 + $0x38] sm:$0xff]  ;;  %s383_s25 = scalar_lea.vmem %s1377_s11, %s1007_s22 }
  0x10   : > { %1038 = vmatprep.subr.mxu0 %v1116_v2  ;;  %1057 = vmatprep.subr.mxu1 %v1116_v2  ;;  %v470_v14 = vld [vmem:[%s1368_s2 + $0x8] sm:$0xff]  ;;  %v387_v16 = vld [vmem:[%s1367_s1] sm:$0xff]  ;;  %v386_v18 = vunpack.c.l.bf16 %v385_v15  ;;  %v755_v37 = vld [vmem:[%s1375_s9 + $0x30] sm:$0xff] }
  0x11   : > { %1039 = vmatpush3.msra.mxu0 %v392_v5  ;;  %1058 = vmatpush3.msra.mxu1 %v474_v6  ;;  %v469_v17 = vld [vmem:[%s1368_s2] sm:$0xff]  ;;  %v758_v32 = vld [vmem:[%s1375_s9 + $0x48] sm:$0xff]  ;;  %v752_v40 = vld [vmem:[%s1375_s9 + $0x18] sm:$0xff] }
  0x12   : > { %1040 = vmatprep.subr.mxu0 %v1116_v2  ;;  %1059 = vmatprep.subr.mxu1 %v1116_v2  ;;  %v645_v19 = vld [vmem:[%s1373_s7] sm:$0xf]  ;;  %v754_v38 = vld [vmem:[%s1375_s9 + $0x28] sm:$0xff]  ;;  %v751_v41 = vld [vmem:[%s1375_s9 + $0x10] sm:$0xff] }
  0x13   : > { %1041 = vmatpush3.msra.mxu0 %v391_v7  ;;  %1060 = vmatpush3.msra.mxu1 %v473_v8  ;;  %v740_v21 = vld [vmem:[%s1374_s8] sm:$0xf]  ;;  %v768_v42 = vld [vmem:[%s1376_s10 + $0x48] sm:$0xff]  ;;  %v766_v46 = vld [vmem:[%s1376_s10 + $0x38] sm:$0xff] }
  0x14   : > { %1042 = vmatprep.subr.mxu0 %v1116_v2  ;;  %1061 = vmatprep.subr.mxu1 %v1116_v2  ;;  %v550_v30 = vld [vmem:[%s1370_s4] sm:$0x3]  ;;  %v750_v43 = vld [vmem:[%s1375_s9 + $0x8] sm:$0xff]  ;;  %v765_v47 = vld [vmem:[%s1376_s10 + $0x30] sm:$0xff] }
  0x15   : > { %1043 = vmatpush3.msra.mxu0 %v390_v9  ;;  %1062 = vmatpush3.msra.mxu1 %v472_v10  ;;  %v549_v31 = vld [vmem:[%s1369_s3] sm:$0x3]  ;;  %v764_v48 = vld [vmem:[%s1376_s10 + $0x28] sm:$0xff]  ;;  %v762_v50 = vld [vmem:[%s1376_s10 + $0x18] sm:$0xff] }
  0x16   : > { %1044 = vmatprep.subr.mxu0 %v1116_v2  ;;  %1063 = vmatprep.subr.mxu1 %v1116_v2  ;;  %v653_v33 = vld [vmem:[%s1372_s6] sm:$0x3]  ;;  %v761_v51 = vld [vmem:[%s1376_s10 + $0x10] sm:$0xff]  ;;  %v760_v52 = vld [vmem:[%s1376_s10 + $0x8] sm:$0xff] }
  0x17   : > { %1045 = vmatpush3.msra.mxu0 %v389_v11  ;;  %1064 = vmatpush3.msra.mxu1 %v471_v12  ;;  %v652_v34 = vld [vmem:[%s1371_s5] sm:$0x3] }
  0x18   : > { %1046 = vmatprep.subr.mxu0 %v1116_v2  ;;  %1065 = vmatprep.subr.mxu1 %v1116_v2  ;;  %v757_v35 = vld [vmem:[%s1375_s9 + $0x40] sm:$0xff] }
  0x19   : > { %1047 = vmatpush3.msra.mxu0 %v388_v13  ;;  %1066 = vmatpush3.msra.mxu1 %v470_v14  ;;  %v753_v39 = vld [vmem:[%s1375_s9 + $0x20] sm:$0xff] }
  0x1a   : > { %1048 = vmatprep.subr.mxu0 %v1116_v2  ;;  %1067 = vmatprep.subr.mxu1 %v1116_v2  ;;  %v767_v44 = vld [vmem:[%s1376_s10 + $0x40] sm:$0xff] }
  0x1b   : > { %1049 = vmatpush3.msra.mxu0 %v387_v16  ;;  %1050 = vmatprep.mubr.msk.f32.mxu0 %vm1117_vm1, %v1116_v2  ;;  %v749_v45 = vld [vmem:[%s1375_s9] sm:$0xff] }
  0x1c   : > { %1068 = vmatpush3.msra.mxu1 %v469_v17  ;;  %1069 = vmatprep.mubr.msk.f32.mxu1 %vm1117_vm1, %v1116_v2  ;;  %v763_v49 = vld [vmem:[%s1376_s10 + $0x20] sm:$0xff] }
  0x1d   : > { %1051 = vmatmul.mubr.msk.f32.vlgmr.msra.gmra.mxu0 %vm395_vm0, %v386_v18  ;;  %1070 = vmatmul.mubr.msk.f32.vlgmr.msra.gmra.mxu1 %vm395_vm0, %v386_v18  ;;  %v759_v53 = vld [vmem:[%s1376_s10] sm:$0xff] }
  0x1e   : > { %1072 = vmatprep.subr.bf16.mxu0 %v1116_v2  ;;  %1078 = vmatprep.subr.bf16.mxu1 %v1116_v2 }
  0x1f   : > { %1074 = vmatprep.mubr.msk.bf16.mxu0 %vm1117_vm1, %v1116_v2  ;;  %1080 = vmatprep.mubr.msk.bf16.mxu1 %vm1117_vm1, %v1116_v2 }
  0x20   : > { %1107 = vset.pattern.permute.xlu0 %v1118_v20 }
  0x21   : > { %648 = vperm.xlu0 %1107, %v645_v19  }
  0x25   : > { %743 = vperm.xlu0 %1107, %v740_v21  }
  0x9c   : > { %v649_v54 = vpop.permute.xlu0 %648 }
  0xa0   : > { %v744_v4 = vpop.permute.xlu0 %743 }
  0xdd   : > { %v465_v22 = vpop.f32.mrf.mxu0  ;;  %v543_v23 = vpop.f32.mrf.mxu1 }
  0xde   : > { %v547_v24 = vpack.c.bf16 %v465_v22, %v465_v22  ;;  %v548_v25 = vpack.c.bf16 %v543_v23, %v543_v23 }
  0xdf   : > { %v1052_v26 = vpop.f32.mrf.mxu0  ;;  %v1071_v27 = vpop.f32.mrf.mxu1 }
  0xe0   : > { %v603_v28 = vsel %vm555_vm2, %v547_v24, 0  ;;  %v557_v29 = vsel %vm555_vm2, %v548_v25, 0 }
  0xe1   : > { %1073 = vmatpush3.bf16.msra.mxu0 %v557_v29  ;;  %1079 = vmatpush3.bf16.msra.mxu1 %v603_v28 }
  0xe2   : > { %1084 = vmatprep.subr.bf16.mxu0 %v1116_v2  ;;  %1090 = vmatprep.subr.bf16.mxu1 %v1116_v2 }
  0xe4   : > { %1075 = vmatmul.mubr.msk.bf16.vlgmr.msra.gmra.mxu0 %vm551_vm3, %v550_v30  ;;  %1081 = vmatmul.mubr.msk.bf16.vlgmr.msra.gmra.mxu1 %vm551_vm3, %v549_v31 }
  0xe5   : > { %1085 = vmatpush3.bf16.msra.mxu0 %v557_v29  ;;  %1091 = vmatpush3.bf16.msra.mxu1 %v603_v28 }
  0xe6   : > { %1086 = vmatprep.mubr.msk.bf16.mxu0 %vm1117_vm1, %v1116_v2  ;;  %1092 = vmatprep.mubr.msk.bf16.mxu1 %vm1117_vm1, %v1116_v2 }
  0xe7   : > { %869 = vmatprep.subr.mxu1 %v758_v32  ;;  %795 = vmatprep.subr.mxu0 %v768_v42 }
  0xec   : > { %1087 = vmatmul.mubr.msk.bf16.vlgmr.msra.gmra.mxu0 %vm551_vm3, %v653_v33  ;;  %1093 = vmatmul.mubr.msk.bf16.vlgmr.msra.gmra.mxu1 %vm551_vm3, %v652_v34 }
  0xed   : > { %870 = vmatpush1.msra.mxu1 %v757_v35  ;;  %911 = vmatprep.mubr.f32.mxu1 %v1116_v2 }
  0xee   : > { %871 = vmatprep.subr.mxu1 %v756_v36  ;;  %837 = vmatprep.mubr.f32.mxu0 %v1116_v2 }
  0xef   : > { %872 = vmatpush1.msra.mxu1 %v755_v37  ;;  %796 = vmatpush1.msra.mxu0 %v767_v44 }
  0xf0   : > { %873 = vmatprep.subr.mxu1 %v754_v38  ;;  %797 = vmatprep.subr.mxu0 %v766_v46 }
  0xf1   : > { %874 = vmatpush1.msra.mxu1 %v753_v39  ;;  %798 = vmatpush1.msra.mxu0 %v765_v47 }
  0xf2   : > { %875 = vmatprep.subr.mxu1 %v752_v40  ;;  %799 = vmatprep.subr.mxu0 %v764_v48 }
  0xf3   : > { %876 = vmatpush1.msra.mxu1 %v751_v41  ;;  %800 = vmatpush1.msra.mxu0 %v763_v49 }
  0xf4   : > { %877 = vmatprep.subr.mxu1 %v750_v43  ;;  %801 = vmatprep.subr.mxu0 %v762_v50 }
  0xf5   : > { %878 = vmatpush1.msra.mxu1 %v749_v45  ;;  %802 = vmatpush1.msra.mxu0 %v761_v51 }
  0xf6   : > { %803 = vmatprep.subr.mxu0 %v760_v52 }
  0xf7   : > { %804 = vmatpush1.msra.mxu0 %v759_v53 }
 0x1a4   : > { %v593_v55 = vpop.f32.mrf.mxu0  ;;  %v639_v56 = vpop.f32.mrf.mxu1 }
 0x1a5   : > { %v640_v57 = vadd.f32 %v639_v56, %v593_v55 }
 0x1a6   : > { %v1076_v58 = vpop.f32.mrf.mxu0  ;;  %v1082_v59 = vpop.f32.mrf.mxu1 }
 0x1a7   : > { %v651_v60 = vadd.f32 %v649_v54, %v640_v57 }
 0x1a8   : > { %v596_v61 = vpop.f32.mrf.mxu0  ;;  %v642_v62 = vpop.f32.mrf.mxu1 }
 0x1a9   : > { %v747_v63 = vmax.f32 %v651_v60, 0.0 }
 0x1aa   : > { %v1077_v0 = vpop.f32.mrf.mxu0  ;;  %v1083_v1 = vpop.f32.mrf.mxu1 }
 0x1ab   : > { %1002 = vmatmul.mubr.msk.f32.vlgmr.msra.gmra.mxu1 %vm769_vm4, %v747_v63 }
 0x1ac   : > { %v691_v2 = vpop.f32.mrf.mxu0  ;;  %v734_v3 = vpop.f32.mrf.mxu1 }
 0x1ad   : > { %v735_v5 = vadd.f32 %v734_v3, %v691_v2 }
 0x1ae   : > { %v1088_v6 = vpop.f32.mrf.mxu0  ;;  %v1094_v7 = vpop.f32.mrf.mxu1 }
 0x1af   : > { %v746_v8 = vadd.f32 %v744_v4, %v735_v5 }
 0x1b0   : > { %v694_v9 = vpop.f32.mrf.mxu0  ;;  %v737_v10 = vpop.f32.mrf.mxu1 }
 0x1b1   : > { %v748_v11 = vmax.f32 %v746_v8, 0.0 }
 0x1b2   : > { %v1089_v12 = vpop.f32.mrf.mxu0  ;;  %v1095_v13 = vpop.f32.mrf.mxu1 }
 0x1b3   : > { %1001 = vmatmul.mubr.msk.f32.vlgmr.msra.gmra.mxu0 %vm769_vm4, %v748_v11 }
 0x26b   : > { %v913_v14 = vpop.f32.mrf.mxu1 }
 0x26d   : > { %v915_v16 = vpop.f32.mrf.mxu1 }
 0x273   : > { %v839_v15 = vpop.f32.mrf.mxu0 }
 0x274   : > { %v914_v18 = vadd.f32 %v913_v14, %v839_v15 }
 0x275   : > { %v841_v17 = vpop.f32.mrf.mxu0 }
 0x276   : > { %v916_v19 = vadd.f32 %v915_v16, %v841_v17 }
 0x278   : > { %v1003_v20 = vpack.c.bf16 %v916_v19, %v914_v18 }
 0x27a   : > { %1004 = vst.sshfl [vmem:[%s383_s25] sm:$0x33 pattern:$0x76325410] %v1003_v20 }
 0x27b PF: > { %s21_s17 = sadd.s32 1, %s1114_s17  }
 0x27c   : > { %p18_p4 = scmp.ge.s32.totalorder %s21_s17, 4  }
 0x27e   :  { %20 = sbr.rel (!%p18_p4) target bundleno = 1 (0x1), region = 94 }

// kernel: spectral_transform.7
= control target key start
LH: loop header
LB: loop body
LE: loop exit
PB: predicated region body
PF: predicated region fallthrough
CT: control target
= control target key end

     0   :  { %s450_s15 = smov 0   ;;  %s476_s0 = inlined_call_operand.vmem [shape: bf16[2,4,256], index: 0, kind: input, shape index: {}]   ;;  %s477_s1 = inlined_call_operand.vmem [shape: bf16[2,4,256], index: 1, kind: input, shape index: {}]   ;;  %s478_s2 = inlined_call_operand.vmem [shape: bf16[2,4,256], index: 2, kind: input, shape index: {}]   ;;  %s479_s3 = inlined_call_operand.vmem [shape: bf16[8,4], index: 3, kind: input, shape index: {}]   ;;  %s480_s4 = inlined_call_operand.vmem [shape: f32[2,8,256], index: 4, kind: output, shape index: {}]  }
   0x1 LB: > { %s386_s16 = sadd.s32 4294967295, %s422_s15   ;;  %p390_p0 = scmp.ge.s32.totalorder %s422_s15, 1  ;;  %s422_s15 = sphi %s450_s15, %s14_s15  }
   0x2   : > { %p182_p1 = scmp.lt.s32.totalorder %s422_s15, 3 }
   0x4   : > { %p183_p2 = pnand %p390_p0, %p182_p1 }
   0x5   : > { %p218_p3 = scmp.lt.s32.totalorder (!%p183_p2), %s386_s16, 1 }
   0x6   : > { %186 = sbr.rel (%p183_p2) target bundleno = 229 (0xe5), region = 36 }
   0xb   : > { %v424_v0 = vmov 0   ;;  %s482_s16 = smov (!%p218_p3, %s386_s16), 1  ;;  %vm257_vm0 = vcmask 1041408   ;;  %v247_v13 = vld [vmem:[%s479_s3] sm:$0xf]  ;;  %vm253_vm1 = vcmask 31744  }
   0xc   : > { %296 = vmatprep.mubr.bf16.mxu0 %v424_v0  ;;  %s403_s17 = sshll.u32 %s482_s16, 2  ;;  %s406_s29 = sshll.u32 %s482_s16, 4 }
   0xd   : > { %s222_s20 = scalar_lea.vmem %s476_s0, %s403_s17  ;;  %s227_s23 = scalar_lea.vmem %s477_s1, %s403_s17 }
   0xe   : > { %s232_s26 = scalar_lea.vmem %s478_s2, %s403_s17  ;;  %v239_v1 = vld [vmem:[%s222_s20] sm:$0xf]  ;;  %s237_s6 = scalar_lea.vmem %s480_s4, %s406_s29 }
   0xf   : > { %v241_v2 = vld [vmem:[%s227_s23] sm:$0xf]  ;;  %v240_v3 = vunpack.c.l.bf16 %v239_v1 }
  0x10   : > { %v242_v4 = vunpack.c.l.bf16 %v241_v2  ;;  %v244_v5 = vld [vmem:[%s232_s26] sm:$0xf] }
  0x11   : > { %v245_v6 = vunpack.c.l.bf16 %v244_v5 }
  0x12   : > { %v243_v7 = vadd.f32 %v242_v4, %v240_v3 }
  0x14   : > { %v246_v8 = vadd.f32 %v245_v6, %v243_v7 }
  0x16   : > { %v249_v9 = vcombine.high %v246_v8, %v246_v8  ;;  %v251_v10 = vpack.c.bf16 %v246_v8, %v246_v8 }
  0x18   : > { %v252_v11 = vpack.c.bf16 %v249_v9, %v249_v9  ;;  %v259_v12 = vsel %vm257_vm0, %v251_v10, 0 }
  0x1a   : > { %399 = vmatprep.subr.msk.bf16.mxu0 %vm257_vm0, %v252_v11 }
  0x1b   : > { %279 = vmatpush1.bf16.msra.mxu0 %v259_v12 }
  0x1e   : > { %400 = vmatmul.mubr.msk.bf16.vlgmr.msra.gmra.mxu0 %vm253_vm1, %v247_v13 }
  0xde   : > { %v298_v14 = vpop.f32.mrf.mxu0 }
  0xdf   : > { %305 = vst [vmem:[%s237_s6] sm:$0xff] %v298_v14 }
  0xe0   : > { %v300_v15 = vpop.f32.mrf.mxu0 }
  0xe1   : > { %306 = vst [vmem:[%s237_s6 + $0x8] sm:$0xff] %v300_v15 }
  0xe2   : > { %v302_v16 = vpop.f32.mrf.mxu0 }
  0xe4   : > { %v303_v17 = vpop.f32.mrf.mxu0 }
  0xe5 PF: > { %s14_s15 = sadd.s32 1, %s422_s15  }
  0xe6   : > { %p11_p4 = scmp.ge.s32.totalorder %s14_s15, 4  }
  0xe8   :  { %13 = sbr.rel (!%p11_p4) target bundleno = 1 (0x1), region = 72 }

</bundles_post_ra>
